<compile_context>
chip_gen: v7x
topology: tpu7x:2x2x1
jax: 0.10.0
libtpu: 0.0.40
codegen_flags: <defaults>
</compile_context>

<pallas_src>
import jax
import jax.numpy as jnp
import numpy as np
from jax import lax
from jax.experimental import pallas as pl
from jax.experimental.pallas import tpu as pltpu


# ---------------------------------------------------------------------------
# helpers
# ---------------------------------------------------------------------------
def _softplus(x):
    # numerically stable softplus, used identically inside the kernel and reference
    return jnp.maximum(x, 0.0) + jnp.log1p(jnp.exp(-jnp.abs(x)))


def _round8(n):
    return ((n + 7) // 8) * 8


def _pack_layout(in_dim, d, H, T, B):
    """Row offsets of every parameter block inside the single packed buffer."""
    assert H % 8 == 0, "hidden width must be a multiple of the f32 sublane tile"
    assert H >= 2 * d, "packed bias column assumes H >= 2*latent_dim"
    lay = {}
    off = 0
    for name, rows in (("ew1", H),      # enc W1^T        (H, in_dim)
                       ("head", 2 * d),  # enc [Wmu;Wstd]^T (2d, H)
                       ("w1z", H),       # dec W1[1:]^T    (H, d)
                       ("w2", H),        # dec W2^T        (H, H)
                       ("tmat", H),      # w1_t ⊗ t        (H, T)
                       ("vec", H),       # bias columns    (H, >=6)
                       ("x", in_dim)):   # x^T             (in_dim, B)
        lay[name] = off
        off += _round8(rows)
    lay["rows"] = off
    lay["width"] = max(8, H, in_dim, d, T, B)
    return lay


# ---------------------------------------------------------------------------
# Fused kernel: encoder MLP + rsample + decoder MLP + std(nz) + mean(T)
# ---------------------------------------------------------------------------
def make_fused_kernel(nz, B, T, in_dim, d, H, lay):
    assert nz >= 2, "unbiased (ddof=1) std requires nz >= 2"
    NB = nz * B
    inv_nz = 1.0 / float(nz)
    inv_nzm1 = 1.0 / float(nz - 1)
    inv_T = 1.0 / float(T)
    L = lay

    def kernel(w_ref, eps_ref, out_ref):
        f32 = jnp.float32

        # ---- unpack parameters (static, sublane-aligned slices, lane offset 0) --
        ew1_T  = w_ref[L["ew1"]:L["ew1"] + H, 0:in_dim]          # (H, in_dim)
        head_T = w_ref[L["head"]:L["head"] + 2 * d, 0:H]         # (2d, H)
        w1z_T  = w_ref[L["w1z"]:L["w1z"] + H, 0:d]               # (H, d)
        w2_T   = w_ref[L["w2"]:L["w2"] + H, 0:H]                 # (H, H)
        tmat   = w_ref[L["tmat"]:L["tmat"] + H, 0:T]             # (H, T) = w1_t ⊗ t
        eb1    = w_ref[L["vec"]:L["vec"] + H, 0:1]               # (H, 1)
        ehb    = w_ref[L["vec"]:L["vec"] + 2 * d, 1:2]           # (2d, 1) [b_mu; b_std]
        db1    = w_ref[L["vec"]:L["vec"] + H, 2:3]               # (H, 1)
        db2    = w_ref[L["vec"]:L["vec"] + H, 3:4]               # (H, 1)
        w3     = w_ref[L["vec"]:L["vec"] + H, 4:5]               # (H, 1)
        b3     = w_ref[L["vec"]:L["vec"] + 1, 5:6]               # (1, 1)
        x_T    = w_ref[L["x"]:L["x"] + in_dim, 0:B]              # (in_dim, B)

        # ---- encoder MLP, transposed layout (batch on the lane axis) ------------
        h_T = jnp.maximum(
            jnp.dot(ew1_T, x_T, preferred_element_type=f32) + eb1, 0.0)   # (H, B)
        head = jnp.dot(head_T, h_T, preferred_element_type=f32) + ehb     # (2d, B)
        mu_T = head[0:d, :]                                               # (d, B)
        std_T = _softplus(head[d:2 * d, :]) + 1e-4                        # (d, B)

        # ---- reparameterized z samples, lane order = i*B + b ---------------------
        mu_rep = jnp.concatenate([mu_T] * nz, axis=1)                     # (d, NB)
        std_rep = jnp.concatenate([std_T] * nz, axis=1)                   # (d, NB)
        z_T = mu_rep + std_rep * eps_ref[...]                             # (d, NB)

        # ---- decoder layer 1: [t_j, z] @ W1 decomposed; T folded onto lanes ------
        zw = jnp.dot(w1z_T, z_T, preferred_element_type=f32) + db1        # (H, NB)
        h1 = jnp.concatenate([zw + tmat[:, j:j + 1] for j in range(T)], axis=1)
        h1 = jnp.maximum(h1, 0.0)                                         # (H, T*NB)

        # ---- decoder layer 2: ONE MXU stream over N = T*nz*B ---------------------
        h2 = jnp.maximum(
            jnp.dot(w2_T, h1, preferred_element_type=f32) + db2, 0.0)     # (H, T*NB)

        # ---- decoder layer 3 (H -> 1): sublane reduce, lane-dense result ---------
        y_row = jnp.sum(h2 * w3, axis=0, keepdims=True) + b3              # (1, T*NB)

        # ---- statistics: unbiased std over the nz samples, then mean over T ------
        y2d = jnp.concatenate(
            [y_row[:, j * NB:(j + 1) * NB] for j in range(T)], axis=0)    # (T, NB)

        # pooling selector over samples: P[i*B + b, b'] = (b == b')
        rr = lax.broadcasted_iota(jnp.int32, (B, B), 0)
        cc = lax.broadcasted_iota(jnp.int32, (B, B), 1)
        eye = (rr == cc).astype(f32)                                      # (B, B)
        P = jnp.concatenate([eye] * nz, axis=0)                           # (NB, B)

        s1 = jnp.dot(y2d, P, preferred_element_type=f32)                  # (T, B): sum_i y
        mean = s1 * inv_nz                                                # (T, B)
        cent = y2d - jnp.concatenate([mean] * nz, axis=1)                 # (T, NB)
        s2 = jnp.dot(cent * cent, P, preferred_element_type=f32)          # (T, B)
        sigma = jnp.sqrt(jnp.maximum(s2 * inv_nzm1, 0.0))                 # (T, B)

        out_ref[...] = jnp.sum(sigma, axis=0, keepdims=True) * inv_T      # (1, B)

    return kernel


# ---------------------------------------------------------------------------
# Forward wrapper: host-side packing + one gridless pallas_call
# ---------------------------------------------------------------------------
def composite_model_uncertainty_forward(x, t, enc, dec, eps):
    nr, nb, in_dim = x.shape
    nz, B_eps, d = eps.shape
    B = nr * nb
    T = t.shape[0]
    H = enc["w1"].shape[1]
    assert B_eps == B
    assert nz >= 2, "unbiased std over nz needs nz >= 2"

    lay = _pack_layout(in_dim, d, H, T, B)
    f32 = jnp.float32

    # ---- single packed parameter/input buffer (one input DMA) -----------------
    # NOTE: in the real acquisition loop the weight/t blocks are fixed across
    # iterations and would be packed once; only the x^T block changes per call.
    w = jnp.zeros((lay["rows"], lay["width"]), f32)
    w = w.at[lay["ew1"]:lay["ew1"] + H, 0:in_dim].set(enc["w1"].T)
    w = w.at[lay["head"]:lay["head"] + 2 * d, 0:H].set(
        jnp.concatenate([enc["wmu"].T, enc["wstd"].T], axis=0))
    w = w.at[lay["w1z"]:lay["w1z"] + H, 0:d].set(dec["w1"][1:, :].T)
    w = w.at[lay["w2"]:lay["w2"] + H, 0:H].set(dec["w2"].T)
    # outer product of the decoder's t-weight row with the (fixed) time grid
    w = w.at[lay["tmat"]:lay["tmat"] + H, 0:T].set(
        dec["w1"][0:1, :].T * t.astype(f32)[None, :])
    w = w.at[lay["vec"]:lay["vec"] + H, 0].set(enc["b1"][0])
    w = w.at[lay["vec"]:lay["vec"] + d, 1].set(enc["bmu"][0])
    w = w.at[lay["vec"] + d:lay["vec"] + 2 * d, 1].set(enc["bstd"][0])
    w = w.at[lay["vec"]:lay["vec"] + H, 2].set(dec["b1"][0])
    w = w.at[lay["vec"]:lay["vec"] + H, 3].set(dec["b2"][0])
    w = w.at[lay["vec"]:lay["vec"] + H, 4].set(dec["w3"][:, 0])
    w = w.at[lay["vec"], 5].set(dec["b3"][0, 0])
    w = w.at[lay["x"]:lay["x"] + in_dim, 0:B].set(x.reshape(B, in_dim).T.astype(f32))

    # eps transposed so nz*B fills the lane axis; column index = i*B + b
    eps_T = jnp.transpose(eps.astype(f32), (2, 0, 1)).reshape(d, nz * B)

    vmem = pl.BlockSpec(memory_space=pltpu.MemorySpace.VMEM)
    # Gridless single-TC launch: at B=8, nz*B=128 the whole working set is < 1 MiB
    # of VMEM and the kernel is launch-bound; a ('parallel',) batch grid only pays
    # off on v7x if B / nz are scaled up.
    out = pl.pallas_call(
        make_fused_kernel(nz, B, T, in_dim, d, H, lay),
        out_shape=jax.ShapeDtypeStruct((1, B), f32),
        in_specs=[vmem, vmem],
        out_specs=vmem,
    )(w, eps_T)

    return out[0].reshape(nr, nb)


# ---------------------------------------------------------------------------
# Pure-JAX reference (same math, same parameters)
# ---------------------------------------------------------------------------
def reference_forward(x, t, enc, dec, eps):
    nr, nb, in_dim = x.shape
    nz = eps.shape[0]
    T = t.shape[0]
    B = nr * nb
    d = enc["wmu"].shape[1]

    x_flat = x.reshape(B, in_dim)
    h = jnp.maximum(x_flat @ enc["w1"] + enc["b1"], 0.0)
    mu = h @ enc["wmu"] + enc["bmu"]
    std = _softplus(h @ enc["wstd"] + enc["bstd"]) + 1e-4
    z = mu[None] + std[None] * eps                           # (nz, B, d)

    t_feat = jnp.broadcast_to(t.reshape(1, 1, T, 1), (nz, B, T, 1))
    z_feat = jnp.broadcast_to(z[:, :, None, :], (nz, B, T, d))
    feats = jnp.concatenate([t_feat, z_feat], axis=-1)       # (nz, B, T, d+1)

    h1 = jnp.maximum(feats @ dec["w1"] + dec["b1"], 0.0)
    h2 = jnp.maximum(h1 @ dec["w2"] + dec["b2"], 0.0)
    y = (h2 @ dec["w3"] + dec["b3"])[..., 0]                 # (nz, B, T)

    sigma = jnp.std(y, axis=0, ddof=1)                       # (B, T), unbiased
    return sigma.mean(axis=-1).reshape(nr, nb)


# ---------------------------------------------------------------------------
# Deterministic synthetic parameters
# ---------------------------------------------------------------------------
def init_params(key, in_dim, d, H):
    ks = jax.random.split(key, 12)

    def w(k, shape, scale):
        return jax.random.normal(k, shape, jnp.float32) * scale

    enc = dict(
        w1=w(ks[0], (in_dim, H), 1.0 / np.sqrt(in_dim)),
        b1=w(ks[1], (1, H), 0.1),
        wmu=w(ks[2], (H, d), 1.0 / np.sqrt(H)),
        bmu=w(ks[3], (1, d), 0.1),
        wstd=w(ks[4], (H, d), 1.0 / np.sqrt(H)),
        bstd=w(ks[5], (1, d), 0.1),
    )
    dec = dict(
        w1=w(ks[6], (d + 1, H), 1.0 / np.sqrt(d + 1)),
        b1=w(ks[7], (1, H), 0.1),
        w2=w(ks[8], (H, H), 1.0 / np.sqrt(H)),
        b2=w(ks[9], (1, H), 0.1),
        w3=w(ks[10], (H, 1), 1.0 / np.sqrt(H)),
        b3=w(ks[11], (1, 1), 0.1),
    )
    return enc, dec


# ---------------------------------------------------------------------------
if __name__ == "__main__":
    # small shapes consistent with the module's forward
    nr, nb, in_dim = 2, 4, 3       # (num_restarts, batch_size, input_dim)
    d, H, nz, T = 8, 32, 16, 8     # latent dim, hidden width, num_z_sample, len(expt.t)

    key = jax.random.PRNGKey(0)
    k_x, k_eps, k_p = jax.random.split(key, 3)

    x = jax.random.uniform(k_x, (nr, nb, in_dim), jnp.float32)
    # TODO(synk): torch's Normal.rsample RNG has no TPU-kernel equivalent;
    #             eps is drawn deterministically with jax.random in the host glue.
    eps = jax.random.normal(k_eps, (nz, nr * nb, d), jnp.float32)
    t = jnp.linspace(0.0, 1.0, T, dtype=jnp.float32)
    enc, dec = init_params(k_p, in_dim, d, H)

    fwd = jax.jit(composite_model_uncertainty_forward)
    acq = jax.block_until_ready(fwd(x, t, enc, dec, eps))

    acq_ref = reference_forward(x, t, enc, dec, eps)
    assert acq.shape == (nr, nb), acq.shape
    if not np.allclose(np.asarray(acq), np.asarray(acq_ref), rtol=1e-3, atol=3e-4):
        raise AssertionError(
            f"mismatch:\nkernel={np.asarray(acq)}\nref={np.asarray(acq_ref)}")

    print("KERNEL_OK")
</pallas_src>

<mosaic_0001>
module attributes {stable_mosaic.version = 11 : i64} {
  func.func @kernel(%arg0: memref<184x32xf32, #tpu.memory_space<vmem>>, %arg1: memref<8x128xf32, #tpu.memory_space<vmem>>, %arg2: memref<1x8xf32, #tpu.memory_space<vmem>>) attributes {dimension_semantics = [], scalar_prefetch = 0 : i64, scratch_operands = 0 : i64, tpu.core_type = #tpu.core_type<tc>} {
    %c0 = arith.constant 0 : index
    %c0_0 = arith.constant 0 : index
    %0 = vector.load %arg0[%c0, %c0_0] : memref<184x32xf32, #tpu.memory_space<vmem>>, vector<32x3xf32>
    %c32 = arith.constant 32 : index
    %c0_1 = arith.constant 0 : index
    %1 = vector.load %arg0[%c32, %c0_1] : memref<184x32xf32, #tpu.memory_space<vmem>>, vector<16x32xf32>
    %c48 = arith.constant 48 : index
    %c0_2 = arith.constant 0 : index
    %2 = vector.load %arg0[%c48, %c0_2] : memref<184x32xf32, #tpu.memory_space<vmem>>, vector<32x8xf32>
    %c80 = arith.constant 80 : index
    %c0_3 = arith.constant 0 : index
    %3 = vector.load %arg0[%c80, %c0_3] : memref<184x32xf32, #tpu.memory_space<vmem>>, vector<32x32xf32>
    %c112 = arith.constant 112 : index
    %c0_4 = arith.constant 0 : index
    %4 = vector.load %arg0[%c112, %c0_4] : memref<184x32xf32, #tpu.memory_space<vmem>>, vector<32x8xf32>
    %c144 = arith.constant 144 : index
    %c0_5 = arith.constant 0 : index
    %5 = vector.load %arg0[%c144, %c0_5] : memref<184x32xf32, #tpu.memory_space<vmem>>, vector<32x1xf32>
    %c144_6 = arith.constant 144 : index
    %c1 = arith.constant 1 : index
    %6 = vector.load %arg0[%c144_6, %c1] : memref<184x32xf32, #tpu.memory_space<vmem>>, vector<16x1xf32>
    %c144_7 = arith.constant 144 : index
    %c2 = arith.constant 2 : index
    %7 = vector.load %arg0[%c144_7, %c2] : memref<184x32xf32, #tpu.memory_space<vmem>>, vector<32x1xf32>
    %c144_8 = arith.constant 144 : index
    %c3 = arith.constant 3 : index
    %8 = vector.load %arg0[%c144_8, %c3] : memref<184x32xf32, #tpu.memory_space<vmem>>, vector<32x1xf32>
    %c144_9 = arith.constant 144 : index
    %c4 = arith.constant 4 : index
    %9 = vector.load %arg0[%c144_9, %c4] : memref<184x32xf32, #tpu.memory_space<vmem>>, vector<32x1xf32>
    %c144_10 = arith.constant 144 : index
    %c5 = arith.constant 5 : index
    %10 = vector.load %arg0[%c144_10, %c5] : memref<184x32xf32, #tpu.memory_space<vmem>>, vector<1x1xf32>
    %c176 = arith.constant 176 : index
    %c0_11 = arith.constant 0 : index
    %11 = vector.load %arg0[%c176, %c0_11] : memref<184x32xf32, #tpu.memory_space<vmem>>, vector<3x8xf32>
    %cst = arith.constant dense<0.000000e+00> : vector<32x8xf32>
    %12 = tpu.matmul %0, %11, %cst {dimension_numbers = #tpu.dot_dimension_numbers<[1], [0], [0], [1], [0, 0, 1, 1], [], []>} : vector<32x3xf32>, vector<3x8xf32>, vector<32x8xf32> -> vector<32x8xf32>
    %13 = vector.broadcast %5 : vector<32x1xf32> to vector<32x8xf32>
    %14 = arith.addf %12, %13 : vector<32x8xf32>
    %cst_12 = arith.constant 0.000000e+00 : f32
    %15 = vector.broadcast %cst_12 : f32 to vector<32x8xf32>
    %16 = arith.maximumf %14, %15 : vector<32x8xf32>
    %cst_13 = arith.constant dense<0.000000e+00> : vector<16x8xf32>
    %17 = tpu.matmul %1, %16, %cst_13 {dimension_numbers = #tpu.dot_dimension_numbers<[1], [0], [0], [1], [0, 0, 1, 1], [], []>} : vector<16x32xf32>, vector<32x8xf32>, vector<16x8xf32> -> vector<16x8xf32>
    %18 = vector.broadcast %6 : vector<16x1xf32> to vector<16x8xf32>
    %19 = arith.addf %17, %18 : vector<16x8xf32>
    %20 = vector.extract_strided_slice %19 {offsets = [0, 0], sizes = [8, 8], strides = [1, 1]} : vector<16x8xf32> to vector<8x8xf32>
    %21 = vector.extract_strided_slice %19 {offsets = [8, 0], sizes = [8, 8], strides = [1, 1]} : vector<16x8xf32> to vector<8x8xf32>
    %cst_14 = arith.constant 0.000000e+00 : f32
    %22 = vector.broadcast %cst_14 : f32 to vector<8x8xf32>
    %23 = arith.maximumf %21, %22 : vector<8x8xf32>
    %24 = math.absf %21 : vector<8x8xf32>
    %cst_15 = arith.constant 0.000000e+00 : f32
    %25 = vector.broadcast %cst_15 : f32 to vector<8x8xf32>
    %26 = arith.subf %25, %24 : vector<8x8xf32>
    %27 = math.exp %26 : vector<8x8xf32>
    %28 = math.log1p %27 : vector<8x8xf32>
    %29 = arith.addf %23, %28 : vector<8x8xf32>
    %cst_16 = arith.constant 9.99999974E-5 : f32
    %30 = vector.broadcast %cst_16 : f32 to vector<8x8xf32>
    %31 = arith.addf %29, %30 : vector<8x8xf32>
    %32 = tpu.concatenate %20, %20, %20, %20, %20, %20, %20, %20, %20, %20, %20, %20, %20, %20, %20, %20 in 1 : vector<8x8xf32>, vector<8x8xf32>, vector<8x8xf32>, vector<8x8xf32>, vector<8x8xf32>, vector<8x8xf32>, vector<8x8xf32>, vector<8x8xf32>, vector<8x8xf32>, vector<8x8xf32>, vector<8x8xf32>, vector<8x8xf32>, vector<8x8xf32>, vector<8x8xf32>, vector<8x8xf32>, vector<8x8xf32> -> vector<8x128xf32>
    %33 = tpu.concatenate %31, %31, %31, %31, %31, %31, %31, %31, %31, %31, %31, %31, %31, %31, %31, %31 in 1 : vector<8x8xf32>, vector<8x8xf32>, vector<8x8xf32>, vector<8x8xf32>, vector<8x8xf32>, vector<8x8xf32>, vector<8x8xf32>, vector<8x8xf32>, vector<8x8xf32>, vector<8x8xf32>, vector<8x8xf32>, vector<8x8xf32>, vector<8x8xf32>, vector<8x8xf32>, vector<8x8xf32>, vector<8x8xf32> -> vector<8x128xf32>
    %c0_17 = arith.constant 0 : index
    %c0_18 = arith.constant 0 : index
    %34 = vector.load %arg1[%c0_17, %c0_18] : memref<8x128xf32, #tpu.memory_space<vmem>>, vector<8x128xf32>
    %35 = arith.mulf %33, %34 : vector<8x128xf32>
    %36 = arith.addf %32, %35 : vector<8x128xf32>
    %cst_19 = arith.constant dense<0.000000e+00> : vector<32x128xf32>
    %37 = tpu.matmul %2, %36, %cst_19 {dimension_numbers = #tpu.dot_dimension_numbers<[1], [0], [0], [1], [0, 0, 1, 1], [], []>} : vector<32x8xf32>, vector<8x128xf32>, vector<32x128xf32> -> vector<32x128xf32>
    %38 = vector.broadcast %7 : vector<32x1xf32> to vector<32x128xf32>
    %39 = arith.addf %37, %38 : vector<32x128xf32>
    %40 = vector.extract_strided_slice %4 {offsets = [0, 0], sizes = [32, 1], strides = [1, 1]} : vector<32x8xf32> to vector<32x1xf32>
    %41 = vector.broadcast %40 : vector<32x1xf32> to vector<32x128xf32>
    %42 = arith.addf %39, %41 : vector<32x128xf32>
    %43 = vector.extract_strided_slice %4 {offsets = [0, 1], sizes = [32, 1], strides = [1, 1]} : vector<32x8xf32> to vector<32x1xf32>
    %44 = vector.broadcast %43 : vector<32x1xf32> to vector<32x128xf32>
    %45 = arith.addf %39, %44 : vector<32x128xf32>
    %46 = vector.extract_strided_slice %4 {offsets = [0, 2], sizes = [32, 1], strides = [1, 1]} : vector<32x8xf32> to vector<32x1xf32>
    %47 = vector.broadcast %46 : vector<32x1xf32> to vector<32x128xf32>
    %48 = arith.addf %39, %47 : vector<32x128xf32>
    %49 = vector.extract_strided_slice %4 {offsets = [0, 3], sizes = [32, 1], strides = [1, 1]} : vector<32x8xf32> to vector<32x1xf32>
    %50 = vector.broadcast %49 : vector<32x1xf32> to vector<32x128xf32>
    %51 = arith.addf %39, %50 : vector<32x128xf32>
    %52 = vector.extract_strided_slice %4 {offsets = [0, 4], sizes = [32, 1], strides = [1, 1]} : vector<32x8xf32> to vector<32x1xf32>
    %53 = vector.broadcast %52 : vector<32x1xf32> to vector<32x128xf32>
    %54 = arith.addf %39, %53 : vector<32x128xf32>
    %55 = vector.extract_strided_slice %4 {offsets = [0, 5], sizes = [32, 1], strides = [1, 1]} : vector<32x8xf32> to vector<32x1xf32>
    %56 = vector.broadcast %55 : vector<32x1xf32> to vector<32x128xf32>
    %57 = arith.addf %39, %56 : vector<32x128xf32>
    %58 = vector.extract_strided_slice %4 {offsets = [0, 6], sizes = [32, 1], strides = [1, 1]} : vector<32x8xf32> to vector<32x1xf32>
    %59 = vector.broadcast %58 : vector<32x1xf32> to vector<32x128xf32>
    %60 = arith.addf %39, %59 : vector<32x128xf32>
    %61 = vector.extract_strided_slice %4 {offsets = [0, 7], sizes = [32, 1], strides = [1, 1]} : vector<32x8xf32> to vector<32x1xf32>
    %62 = vector.broadcast %61 : vector<32x1xf32> to vector<32x128xf32>
    %63 = arith.addf %39, %62 : vector<32x128xf32>
    %64 = tpu.concatenate %42, %45, %48, %51, %54, %57, %60, %63 in 1 : vector<32x128xf32>, vector<32x128xf32>, vector<32x128xf32>, vector<32x128xf32>, vector<32x128xf32>, vector<32x128xf32>, vector<32x128xf32>, vector<32x128xf32> -> vector<32x1024xf32>
    %cst_20 = arith.constant 0.000000e+00 : f32
    %65 = vector.broadcast %cst_20 : f32 to vector<32x1024xf32>
    %66 = arith.maximumf %64, %65 : vector<32x1024xf32>
    %cst_21 = arith.constant dense<0.000000e+00> : vector<32x1024xf32>
    %67 = tpu.matmul %3, %66, %cst_21 {dimension_numbers = #tpu.dot_dimension_numbers<[1], [0], [0], [1], [0, 0, 1, 1], [], []>} : vector<32x32xf32>, vector<32x1024xf32>, vector<32x1024xf32> -> vector<32x1024xf32>
    %68 = vector.broadcast %8 : vector<32x1xf32> to vector<32x1024xf32>
    %69 = arith.addf %67, %68 : vector<32x1024xf32>
    %cst_22 = arith.constant 0.000000e+00 : f32
    %70 = vector.broadcast %cst_22 : f32 to vector<32x1024xf32>
    %71 = arith.maximumf %69, %70 : vector<32x1024xf32>
    %72 = vector.broadcast %9 : vector<32x1xf32> to vector<32x1024xf32>
    %73 = arith.mulf %71, %72 : vector<32x1024xf32>
    %cst_23 = arith.constant dense<0.000000e+00> : vector<1024xf32>
    %74 = vector.multi_reduction <add>, %73, %cst_23 [0] : vector<32x1024xf32> to vector<1024xf32>
    %75 = vector.shape_cast %74 : vector<1024xf32> to vector<1x1024xf32>
    %76 = vector.broadcast %10 : vector<1x1xf32> to vector<1x1024xf32>
    %77 = arith.addf %75, %76 : vector<1x1024xf32>
    %78 = vector.extract_strided_slice %77 {offsets = [0, 0], sizes = [1, 128], strides = [1, 1]} : vector<1x1024xf32> to vector<1x128xf32>
    %79 = vector.extract_strided_slice %77 {offsets = [0, 128], sizes = [1, 128], strides = [1, 1]} : vector<1x1024xf32> to vector<1x128xf32>
    %80 = vector.extract_strided_slice %77 {offsets = [0, 256], sizes = [1, 128], strides = [1, 1]} : vector<1x1024xf32> to vector<1x128xf32>
    %81 = vector.extract_strided_slice %77 {offsets = [0, 384], sizes = [1, 128], strides = [1, 1]} : vector<1x1024xf32> to vector<1x128xf32>
    %82 = vector.extract_strided_slice %77 {offsets = [0, 512], sizes = [1, 128], strides = [1, 1]} : vector<1x1024xf32> to vector<1x128xf32>
    %83 = vector.extract_strided_slice %77 {offsets = [0, 640], sizes = [1, 128], strides = [1, 1]} : vector<1x1024xf32> to vector<1x128xf32>
    %84 = vector.extract_strided_slice %77 {offsets = [0, 768], sizes = [1, 128], strides = [1, 1]} : vector<1x1024xf32> to vector<1x128xf32>
    %85 = vector.extract_strided_slice %77 {offsets = [0, 896], sizes = [1, 128], strides = [1, 1]} : vector<1x1024xf32> to vector<1x128xf32>
    %86 = tpu.concatenate %78, %79, %80, %81, %82, %83, %84, %85 in 0 : vector<1x128xf32>, vector<1x128xf32>, vector<1x128xf32>, vector<1x128xf32>, vector<1x128xf32>, vector<1x128xf32>, vector<1x128xf32>, vector<1x128xf32> -> vector<8x128xf32>
    %87 = tpu.iota {dimensions = array<i32: 0>} : vector<8x8xi32>
    %88 = tpu.iota {dimensions = array<i32: 1>} : vector<8x8xi32>
    %89 = arith.cmpi eq, %87, %88 : vector<8x8xi32>
    %90 = arith.extui %89 : vector<8x8xi1> to vector<8x8xi32>
    %91 = arith.sitofp %90 : vector<8x8xi32> to vector<8x8xf32>
    %92 = tpu.concatenate %91, %91, %91, %91, %91, %91, %91, %91, %91, %91, %91, %91, %91, %91, %91, %91 in 0 : vector<8x8xf32>, vector<8x8xf32>, vector<8x8xf32>, vector<8x8xf32>, vector<8x8xf32>, vector<8x8xf32>, vector<8x8xf32>, vector<8x8xf32>, vector<8x8xf32>, vector<8x8xf32>, vector<8x8xf32>, vector<8x8xf32>, vector<8x8xf32>, vector<8x8xf32>, vector<8x8xf32>, vector<8x8xf32> -> vector<128x8xf32>
    %cst_24 = arith.constant dense<0.000000e+00> : vector<8x8xf32>
    %93 = tpu.matmul %86, %92, %cst_24 {dimension_numbers = #tpu.dot_dimension_numbers<[1], [0], [0], [1], [0, 0, 1, 1], [], []>} : vector<8x128xf32>, vector<128x8xf32>, vector<8x8xf32> -> vector<8x8xf32>
    %cst_25 = arith.constant 6.250000e-02 : f32
    %94 = vector.broadcast %cst_25 : f32 to vector<8x8xf32>
    %95 = arith.mulf %93, %94 : vector<8x8xf32>
    %96 = tpu.concatenate %95, %95, %95, %95, %95, %95, %95, %95, %95, %95, %95, %95, %95, %95, %95, %95 in 1 : vector<8x8xf32>, vector<8x8xf32>, vector<8x8xf32>, vector<8x8xf32>, vector<8x8xf32>, vector<8x8xf32>, vector<8x8xf32>, vector<8x8xf32>, vector<8x8xf32>, vector<8x8xf32>, vector<8x8xf32>, vector<8x8xf32>, vector<8x8xf32>, vector<8x8xf32>, vector<8x8xf32>, vector<8x8xf32> -> vector<8x128xf32>
    %97 = arith.subf %86, %96 : vector<8x128xf32>
    %98 = arith.mulf %97, %97 : vector<8x128xf32>
    %cst_26 = arith.constant dense<0.000000e+00> : vector<8x8xf32>
    %99 = tpu.matmul %98, %92, %cst_26 {dimension_numbers = #tpu.dot_dimension_numbers<[1], [0], [0], [1], [0, 0, 1, 1], [], []>} : vector<8x128xf32>, vector<128x8xf32>, vector<8x8xf32> -> vector<8x8xf32>
    %cst_27 = arith.constant 0.0666666701 : f32
    %100 = vector.broadcast %cst_27 : f32 to vector<8x8xf32>
    %101 = arith.mulf %99, %100 : vector<8x8xf32>
    %cst_28 = arith.constant 0.000000e+00 : f32
    %102 = vector.broadcast %cst_28 : f32 to vector<8x8xf32>
    %103 = arith.maximumf %101, %102 : vector<8x8xf32>
    %104 = math.sqrt %103 : vector<8x8xf32>
    %cst_29 = arith.constant dense<0.000000e+00> : vector<8xf32>
    %105 = vector.multi_reduction <add>, %104, %cst_29 [0] : vector<8x8xf32> to vector<8xf32>
    %106 = vector.shape_cast %105 : vector<8xf32> to vector<1x8xf32>
    %cst_30 = arith.constant 1.250000e-01 : f32
    %107 = vector.broadcast %cst_30 : f32 to vector<1x8xf32>
    %108 = arith.mulf %106, %107 : vector<1x8xf32>
    %c0_31 = arith.constant 0 : index
    %c0_32 = arith.constant 0 : index
    %109 = vector.load %arg2[%c0_31, %c0_32] : memref<1x8xf32, #tpu.memory_space<vmem>>, vector<1x8xf32>
    tpu.vector_store %arg2[%c0_31, %c0_32], %108 {strides = array<i32>} : memref<1x8xf32, #tpu.memory_space<vmem>>, vector<1x8xf32>,
    return
  }
}

</mosaic_0001>

<bundles_post_ra>
// kernel: squeeze.15
= control target key start
LH: loop header
LB: loop body
LE: loop exit
PB: predicated region body
PF: predicated region fallthrough
CT: control target
= control target key end

     0   :  { %s85_s0 = inlined_call_operand.vmem [shape: f32[8], index: 0, kind: input, shape index: {}]   ;;  %s86_s1 = inlined_call_operand.hbm [shape: f32[2,4], index: 1, kind: output, shape index: {}]  }
   0x1   :  { %v5_v0 = vld [vmem:[%s85_s0] sm:$0x1] }
   0x2   :  { %2 = vsyncpa [#allocation1], 0  ;;  %6 = vst [vmem:[#allocation3] sm:$0x1] %v5_v0  ;;  %vm8_vm0 = vcmask 31744   ;;  %s58_s0 = smov 124  }
   0x3   :  { %s59_s8 = smov [#allocation0]  }
   0x4   :  { %s26_s9 = sshll.u32 %s59_s8, 4  ;;  %s27_s9 = int_to_ptr.vmem [resolvable:$true] %s26_s9 }
   0x5   :  { %s34_s10 = scalar_lea.vmem %s27_s9, 32  ;;  %p39_p1 = scmp.lt.s32.totalorder %s27_s9, %s27_s9 }
   0x6   :  { %p35_p0 = scmp.ne.s32.totalorder %s27_s9, %s34_s10  ;;  %p40_p2 = scmp.lt.s32.totalorder %s34_s10, %s34_s10 }
   0x8   :  { %p41_p3 = por %p40_p2, %p39_p1 }
   0x9   :  { %v10_v1 = vld [vmem:[#allocation3] sm:$0x1]  }
   0xa   :  { %v7_v2 = vld [vmem:[#allocation3] sm:$0x1]   ;;  %11 = vrot.lane.b32.xlu0 %v10_v1, %s58_s0  ;;  %p42_p4 = pnand %p41_p3, %p35_p0 }
   0xb   :  { %9 = vst.msk [vmem:[#allocation2] sm:$0x1] %vm8_vm0, %v7_v2  }
  0x7c   :  { %v12_v3 = vpop.permute.xlu0 %11  }
  0x7d   :  { %15 = vst.msk [vmem:[#allocation2 + $0x1] sm:$0x1] %vm8_vm0, %v12_v3  }
  0x84   :  { %v19_v4 = vld [vmem:[#allocation2] sm:$0x3] }
  0x85   :  { %21 = vst [vmem:[#allocation0] sm:$0x3] %v19_v4 }
  0x86   :  { %45 = shalt.err (!%p42_p4)
}
  0x87   :  { %s46_s13 = scalar_lea.hbm %s86_s1, 32 }
  0x88   :  { %p47_p5 = scmp.ne.s32.totalorder %s86_s1, %s46_s13  ;;  %p50_p6 = scmp.lt.u32.totalorder %s46_s13, %s86_s1 }
  0x8a   :  { %p52_p7 = pnand %p50_p6, %p47_p5 }
  0x8c   :  { %55 = shalt.err (!%p52_p7)
}
  0x8d   :  { %29 = dma.vmem_to_hbm [thread:$0]  %s27_s9, 32, %s86_s1, [#allocation1]  }
  0x8e   :  { %56 = dma.done.wait [#allocation1], 32  }
  0x8f   :  { %57 = vsyncadd [#allocation1], 4294967264 }
  0x90   :  { %31 = vsyncpa [#allocation1], 1 }

// kernel: composite_model_uncertainty_forward.1
= control target key start
LH: loop header
LB: loop body
LE: loop exit
PB: predicated region body
PF: predicated region fallthrough
CT: control target
= control target key end

     0   :  { %vm68_vm0 = vcmask 1042432   ;;  %vm55_vm1 = vcmask 23552   ;;  %v1893_v3 = vmov 0   ;;  %vm169_vm2 = vcmask 261120   ;;  %s1895_s3 = smov 8   ;;  %s1896_s4 = smov 16   ;;  %s2497_s0 = inlined_call_operand.vmem [shape: f32[184,32], index: 0, kind: input, shape index: {}]   ;;  %s2498_s1 = inlined_call_operand.vmem [shape: f32[8,128], index: 1, kind: input, shape index: {}]   ;;  %s2499_s2 = inlined_call_operand.vmem [shape: f32[1,8], index: 2, kind: output, shape index: {}]  }
   0x1   :  { %v34_v0 = vld [vmem:[%s2497_s0 + $0xb0] sm:$0x7]  ;;  %v11_v1 = vld [vmem:[%s2497_s0] sm:$0xff]  ;;  %v12_v2 = vld [vmem:[%s2497_s0 + $0x8] sm:$0xff]  ;;  %1854 = vset.pattern.permute.xlu0 %v1893_v3  ;;  %1855 = vset.pattern.permute.xlu1 %v1893_v3  ;;  %v1894_v11 = vmov 1   ;;  %s1897_s5 = smov 24  }
   0x2   :  { %1642 = vmatprep.subr.msk.mxu0 %vm68_vm0, %v34_v0  ;;  %1644 = vmatprep.mubr.msk.f32.mxu0 %vm55_vm1, %v11_v1  ;;  %v13_v4 = vld [vmem:[%s2497_s0 + $0x10] sm:$0xff]  ;;  %v1961_v6 = vld [vmem:[%s2497_s0 + $0xa0] sm:$0xff]  ;;  %v1968_v7 = vld [vmem:[%s2497_s0 + $0x98] sm:$0xff]  ;;  %s1898_s6 = smov 32   ;;  %s1899_s7 = smov 40   ;;  %v1909_v52 = vmov 2  }
   0x3   :  { %v1954_v5 = vld [vmem:[%s2497_s0 + $0x90] sm:$0xff]  ;;  %1643 = vmatpush3.msk.msra.mxu0 %vm68_vm0, %v34_v0  ;;  %47 = vperm.xlu1 %1855, %v1961_v6   ;;  %v14_v8 = vld [vmem:[%s2497_s0 + $0x18] sm:$0xff]  ;;  %v1977_v9 = vld [vmem:[%s2497_s0 + $0xa8] sm:$0xff]  ;;  %s1900_s8 = smov 48   ;;  %s1901_s9 = smov 56   ;;  %vm313_vm4 = vcmask 64512  }
   0x4   :  { %37 = vperm.xlu0 %1854, %v1954_v5   ;;  %1645 = vmatmul.mubr.msk.f32.vlgmr.msra.gmra.mrb[0].mxu0 %vm55_vm1, %v12_v2  ;;  %v15_v10 = vld [vmem:[%s2497_s0 + $0x20] sm:$0xff]  ;;  %v16_v30 = vld [vmem:[%s2497_s0 + $0x28] sm:$0xff]  ;;  %s1902_s10 = smov 64   ;;  %s1903_s11 = smov 72   ;;  %v2051_v53 = vld [vmem:[%s2497_s0 + $0x70] sm:$0xff]  ;;  %v1911_v56 = vmov 3  }
   0x5   :  { %1647 = vmatprep.mubr.msk.f32.mxu0 %vm55_vm1, %v13_v4  ;;  %1658 = vmatprep.mubr.msk.f32.mxu1 %vm169_vm2, %v15_v10  ;;  %s1904_s12 = smov 80   ;;  %s1905_s13 = smov 88   ;;  %v26_v54 = vld [vmem:[%s2497_s0 + $0x78] sm:$0xff]  ;;  %v17_v55 = vld [vmem:[%s2497_s0 + $0x30] sm:$0xff]  ;;  %v2080_v57 = vld [vmem:[%s2497_s0 + $0x80] sm:$0xff]  ;;  %v1912_v61 = vmov 5  }
   0x6   :  { %s1906_s14 = smov 96   ;;  %s1907_s15 = smov 104   ;;  %v2086_v58 = vld [vmem:[%s2497_s0 + $0x88] sm:$0xff]  ;;  %v1913_v63 = vmov 4   ;;  %v1914_v0 = vmov 6   ;;  %v1915_v2 = vmov 7  }
   0x7   :  { %52 = vperm.xlu1 %1855, %v1977_v9   ;;  %s1908_s16 = smov 112   ;;  %s1910_s23 = smov 120   ;;  %vm315_vm5 = vcmask 130048   ;;  %vm317_vm6 = vcmask 195584   ;;  %vm320_vm7 = vcmask 326656   ;;  %vm322_vm8 = vcmask 392192  }
   0x8   :  { %42 = vperm.xlu0 %1854, %v1968_v7   ;;  %1648 = vmatmul.mubr.msk.f32.gmra.mrb[2].mxu0 %vm55_vm1, %v14_v8  ;;  %vm324_vm9 = vcmask 457728   ;;  %vm326_vm10 = vcmask 523264   ;;  %vm328_vm11 = vcmask 588800   ;;  %vm330_vm12 = vcmask 654336  }
   0x9   :  { %1663 = vmatprep.mubr.msk.f32.mxu0 %vm313_vm4, %v17_v55  ;;  %vm332_vm13 = vcmask 719872   ;;  %vm2503_vm14 = vcmask 785408   ;;  %vm2502_vm15 = vcmask 850944   ;;  %vm2500_vm1 = vcmask 982016  }
   0xb   :  { %1857 = vset.pattern.permute.xlu1 %v1894_v11 }
   0xc   :  { %1856 = vset.pattern.permute.xlu0 %v1894_v11  ;;  %162 = vperm.xlu1 %1857, %v1954_v5  }
   0xd   :  { %166 = vperm.xlu0 %1856, %v1968_v7  }
  0x10   :  { %1858 = vset.pattern.permute.xlu1 %v1909_v52 }
  0x82   :  { %v48_v13 = vpop.permute.xlu1 %47 }
  0x83   :  { %v38_v12 = vpop.permute.xlu0 %37 }
  0x86   :  { %v53_v20 = vpop.permute.xlu1 %52 }
  0x87   :  { %v43_v14 = vpop.permute.xlu0 %42 }
  0x8b   :  { %v163_v32 = vpop.permute.xlu1 %162 }
  0x8c   :  { %v167_v31 = vpop.permute.xlu0 %166 }
  0xd7   :  { %v1646_v15 = vpop.f32.mrb[0].mxu0 }
  0xd8   :  { %v144_v16 = vadd.f32 %v1646_v15, %v43_v14  ;;  %v138_v17 = vpop.f32.mrb[1].mxu0 }
  0xd9   :  { %v139_v18 = vadd.f32 %v138_v17, %v38_v12 }
  0xda   :  { %v158_v19 = vmax.f32 %v144_v16, 0.0 }
  0xdb   :  { %v157_v21 = vmax.f32 %v139_v18, 0.0  ;;  %v1649_v22 = vpop.f32.mrb[2].mxu0 }
  0xdc   :  { %v154_v23 = vadd.f32 %v1649_v22, %v53_v20  ;;  %v148_v24 = vpop.f32.mrb[3].mxu0 }
  0xdd   :  { %v149_v25 = vadd.f32 %v148_v24, %v48_v13  ;;  %v1739_v26 = vpack.c.bf16 %v158_v19, %v157_v21 }
  0xde   :  { %v160_v27 = vmax.f32 %v154_v23, 0.0 }
  0xdf   :  { %v159_v28 = vmax.f32 %v149_v25, 0.0  ;;  %1740 = vmatprep.subr.bf16.mxu1 %v1739_v26 }
  0xe0   :  { %1742 = vmatpush3.bf16.msra.mxu1 %v1739_v26 }
  0xe1   :  { %v1743_v29 = vpack.c.bf16 %v160_v27, %v159_v28 }
  0xe3   :  { %1744 = vmatprep.subr.bf16.mxu1 %v1743_v29 }
  0xe4   :  { %1746 = vmatpush3.bf16.msra.mxu1 %v1743_v29 }
  0xe7   :  { %1659 = vmatmul.mubr.msk.f32.vlgmr.msra.gmra.mrb[0].mxu1 %vm169_vm2, %v16_v30 }
 0x1ba   :  { %v1660_v33 = vpop.f32.mrb[0].mxu1 }
 0x1bb   :  { %v248_v34 = vadd.f32 %v1660_v33, %v167_v31  ;;  %v242_v35 = vpop.f32.mrb[1].mxu1 }
 0x1bc   :  { %v1994_v36 = vadd.f32 %v242_v35, %v163_v32 }
 0x1bd   :  { %v252_v37 = vand.u32 2147483647, %v248_v34  ;;  %v251_v48 = vmax.f32 %v248_v34, 0.0 }
 0x1be   :  { %268 = vrot.lane.b32.xlu1 %v1994_v36, %s1895_s3 }
 0x1bf   :  { %v253_v38 = vsub.f32 0.0, %v252_v37 }
 0x1c1   :  { %v254_v39 = vmul.f32 1.442695, %v253_v38 }
 0x1c2   :  { %271 = vrot.lane.b32.xlu1 %v1994_v36, %s1896_s4 }
 0x1c3   :  { %1887 = vpow2.f32 %v254_v39 }
 0x1c6   :  { %274 = vrot.lane.b32.xlu1 %v1994_v36, %s1897_s5 }
 0x1ca   :  { %277 = vrot.lane.b32.xlu1 %v1994_v36, %s1898_s6 }
 0x1cd   :  { %v1888_v40 = vpop.eup %1887 }
 0x1ce   :  { %v256_v41 = vadd.f32 1.0, %v1888_v40  ;;  %280 = vrot.lane.b32.xlu1 %v1994_v36, %s1899_s7  ;;  %v259_v42 = vmul.f32 -0.5, %v1888_v40  ;;  %v262_v44 = vand.u32 2147483647, %v1888_v40 }
 0x1d0   :  { %1889 = vlog2.f32 %v256_v41  ;;  %v260_v43 = vadd.f32 1.0, %v259_v42  ;;  %vm263_vm3 = vcmp.lt.f32.partialorder %v262_v44, 0.0004427343 }
 0x1d2   :  { %283 = vrot.lane.b32.xlu1 %v1994_v36, %s1900_s8  ;;  %v261_v47 = vmul.f32 %v1888_v40, %v260_v43 }
 0x1d6   :  { %286 = vrot.lane.b32.xlu1 %v1994_v36, %s1901_s9 }
 0x1da   :  { %v1890_v45 = vpop.eup %1889  ;;  %289 = vrot.lane.b32.xlu1 %v1994_v36, %s1902_s10 }
 0x1db   :  { %v258_v46 = vmul.f32 0.6931472, %v1890_v45 }
 0x1dd   :  { %v264_v49 = vsel %vm263_vm3, %v261_v47, %v258_v46  ;;  %vm2501_vm3 = vcmask 916480  }
 0x1de   :  { %v265_v50 = vadd.f32 %v264_v49, %v251_v48  ;;  %292 = vrot.lane.b32.xlu1 %v1994_v36, %s1903_s11 }
 0x1e0   :  { %v2014_v51 = vadd.f32 0.0001, %v265_v50 }
 0x1e2   :  { %346 = vrot.lane.b32.xlu0 %v2014_v51, %s1896_s4  ;;  %295 = vrot.lane.b32.xlu1 %v1994_v36, %s1904_s12 }
 0x1e6   :  { %349 = vrot.lane.b32.xlu0 %v2014_v51, %s1897_s5  ;;  %343 = vrot.lane.b32.xlu1 %v2014_v51, %s1895_s3 }
 0x1ea   :  { %352 = vrot.lane.b32.xlu0 %v2014_v51, %s1898_s6  ;;  %298 = vrot.lane.b32.xlu1 %v1994_v36, %s1905_s13 }
 0x1ee   :  { %355 = vrot.lane.b32.xlu0 %v2014_v51, %s1899_s7  ;;  %301 = vrot.lane.b32.xlu1 %v1994_v36, %s1906_s14 }
 0x1f2   :  { %358 = vrot.lane.b32.xlu0 %v2014_v51, %s1900_s8  ;;  %304 = vrot.lane.b32.xlu1 %v1994_v36, %s1907_s15 }
 0x1f6   :  { %361 = vrot.lane.b32.xlu0 %v2014_v51, %s1901_s9  ;;  %307 = vrot.lane.b32.xlu1 %v1994_v36, %s1908_s16 }
 0x1fa   :  { %364 = vrot.lane.b32.xlu0 %v2014_v51, %s1902_s10  ;;  %407 = vperm.xlu1 %1858, %v1954_v5  }
 0x1fe   :  { %367 = vrot.lane.b32.xlu0 %v2014_v51, %s1903_s11  ;;  %1859 = vset.pattern.permute.xlu1 %v1894_v11 }
 0x1ff   :  { %544 = vperm.xlu1 %1859, %v2051_v53  }
 0x202   :  { %370 = vrot.lane.b32.xlu0 %v2014_v51, %s1904_s12 }
 0x203   :  { %548 = vperm.xlu1 %1859, %v26_v54  }
 0x206   :  { %373 = vrot.lane.b32.xlu0 %v2014_v51, %s1905_s13 }
 0x207   :  { %1860 = vset.pattern.permute.xlu1 %v1893_v3 }
 0x208   :  { %526 = vperm.xlu1 %1860, %v26_v54  }
 0x20a   :  { %376 = vrot.lane.b32.xlu0 %v2014_v51, %s1906_s14 }
 0x20c   :  { %1861 = vset.pattern.permute.xlu1 %v1909_v52 }
 0x20d   :  { %415 = vperm.xlu1 %1861, %v1961_v6  }
 0x20e   :  { %379 = vrot.lane.b32.xlu0 %v2014_v51, %s1907_s15 }
 0x211   :  { %1862 = vset.pattern.permute.xlu1 %v1911_v56 }
 0x212   :  { %382 = vrot.lane.b32.xlu0 %v2014_v51, %s1908_s16  ;;  %584 = vperm.xlu1 %1862, %v2051_v53  }
 0x216   :  { %385 = vrot.lane.b32.xlu0 %v2014_v51, %s1910_s23  ;;  %588 = vperm.xlu1 %1862, %v26_v54  }
 0x21a   :  { %310 = vrot.lane.b32.xlu0 %v1994_v36, %s1910_s23  ;;  %1863 = vset.pattern.permute.xlu1 %v1909_v52 }
 0x21b   :  { %568 = vperm.xlu1 %1863, %v26_v54  }
 0x21e   :  { %552 = vperm.xlu0 %1856, %v2080_v57  }
 0x21f   :  { %1865 = vset.pattern.permute.xlu1 %v1894_v11 }
 0x220   :  { %556 = vperm.xlu1 %1865, %v2086_v58  }
 0x222   :  { %1864 = vset.pattern.permute.xlu0 %v1893_v3 }
 0x223   :  { %521 = vperm.xlu0 %1864, %v2051_v53  }
 0x224   :  { %1866 = vset.pattern.permute.xlu1 %v1893_v3 }
 0x225   :  { %531 = vperm.xlu1 %1866, %v2080_v57  }
 0x227   :  { %536 = vperm.xlu0 %1864, %v2086_v58  }
 0x229   :  { %1868 = vset.pattern.permute.xlu1 %v1911_v56 }
 0x22a   :  { %592 = vperm.xlu1 %1868, %v2080_v57  }
 0x22b   :  { %1867 = vset.pattern.permute.xlu0 %v1909_v52 }
 0x22c   :  { %411 = vperm.xlu0 %1867, %v1968_v7  }
 0x22e   :  { %596 = vperm.xlu1 %1868, %v2086_v58  }
 0x230   :  { %419 = vperm.xlu0 %1867, %v1977_v9   ;;  %v2101_v59 = vpop.permute.xlu1 %268 }
 0x231   :  { %v314_v30 = vsel %vm313_vm4, %v1994_v36, %v2101_v59 }
 0x232   :  { %1869 = vset.pattern.permute.xlu1 %v1909_v52 }
 0x233   :  { %576 = vperm.xlu1 %1869, %v2086_v58  }
 0x234   :  { %564 = vperm.xlu0 %1867, %v2051_v53   ;;  %v2105_v60 = vpop.permute.xlu1 %271 }
 0x235   :  { %v316_v32 = vsel %vm315_vm5, %v314_v30, %v2105_v60 }
 0x237   :  { %1870 = vset.pattern.permute.xlu1 %v1912_v61 }
 0x238   :  { %572 = vperm.xlu0 %1867, %v2080_v57   ;;  %624 = vperm.xlu1 %1870, %v2051_v53   ;;  %v2108_v62 = vpop.permute.xlu1 %274 }
 0x239   :  { %v318_v34 = vsel %vm317_vm6, %v316_v32, %v2108_v62  ;;  %v18_v62 = vld [vmem:[%s2497_s0 + $0x38] sm:$0xff] }
 0x23c   :  { %1871 = vset.pattern.permute.xlu0 %v1912_v61  ;;  %1872 = vset.pattern.permute.xlu1 %v1913_v63  ;;  %v2111_v1 = vpop.permute.xlu1 %277 }
 0x23d   :  { %628 = vperm.xlu0 %1871, %v26_v54   ;;  %604 = vperm.xlu1 %1872, %v2051_v53   ;;  %v319_v35 = vsel %vm169_vm2, %v318_v34, %v2111_v1 }
 0x240   :  { %v2115_v3 = vpop.permute.xlu1 %280 }
 0x241   :  { %1875 = vset.pattern.permute.xlu0 %v1914_v0  ;;  %608 = vperm.xlu1 %1872, %v26_v54   ;;  %v321_v37 = vsel %vm320_vm7, %v319_v35, %v2115_v3 }
 0x242   :  { %648 = vperm.xlu0 %1875, %v26_v54  }
 0x244   :  { %v2119_v4 = vpop.permute.xlu1 %283 }
 0x245   :  { %1873 = vset.pattern.permute.xlu1 %v1915_v2  ;;  %v323_v40 = vsel %vm322_vm8, %v321_v37, %v2119_v4 }
 0x246   :  { %1877 = vset.pattern.permute.xlu0 %v1913_v63  ;;  %668 = vperm.xlu1 %1873, %v26_v54  }
 0x247   :  { %612 = vperm.xlu0 %1877, %v2080_v57  }
 0x248   :  { %v2124_v11 = vpop.permute.xlu1 %286 }
 0x249   :  { %v325_v43 = vsel %vm324_vm9, %v323_v40, %v2124_v11 }
 0x24a   :  { %1874 = vset.pattern.permute.xlu1 %v1914_v0 }
 0x24b   :  { %1878 = vset.pattern.permute.xlu0 %v1915_v2  ;;  %644 = vperm.xlu1 %1874, %v2051_v53  }
 0x24c   :  { %664 = vperm.xlu0 %1878, %v2051_v53   ;;  %v290_v13 = vpop.permute.xlu1 %289  ;;  %v403_v53 = vld [vmem:[%s2498_s1] sm:$0xff] }
 0x24d   :  { %v327_v44 = vsel %vm326_vm10, %v325_v43, %v290_v13 }
 0x24f   :  { %1876 = vset.pattern.permute.xlu1 %v1912_v61 }
 0x250   :  { %676 = vperm.xlu0 %1878, %v2086_v58   ;;  %632 = vperm.xlu1 %1876, %v2080_v57   ;;  %v293_v16 = vpop.permute.xlu1 %292 }
 0x251   :  { %v329_v46 = vsel %vm328_vm11, %v327_v44, %v293_v16  ;;  %v33_v16 = vld [vmem:[%s2497_s0 + $0x90] sm:$0x1] }
 0x254   :  { %v347_v8 = vpop.permute.xlu0 %346  ;;  %1882 = vset.pattern.permute.xlu0 %v1911_v56  ;;  %636 = vperm.xlu1 %1876, %v2086_v58   ;;  %v296_v18 = vpop.permute.xlu1 %295 }
 0x255   :  { %716 = vperm.xlu0 %1882, %v1954_v5   ;;  %v331_v48 = vsel %vm330_vm12, %v329_v46, %v296_v18 }
 0x258   :  { %v350_v10 = vpop.permute.xlu0 %349  ;;  %1879 = vset.pattern.permute.xlu1 %v1913_v63  ;;  %v344_v21 = vpop.permute.xlu1 %343 }
 0x259   :  { %728 = vperm.xlu0 %1882, %v1977_v9   ;;  %616 = vperm.xlu1 %1879, %v2086_v58   ;;  %v388_v23 = vsel %vm313_vm4, %v2014_v51, %v344_v21 }
 0x25a   :  { %v389_v25 = vsel %vm315_vm5, %v388_v23, %v347_v8 }
 0x25b   :  { %v390_v27 = vsel %vm317_vm6, %v389_v25, %v350_v10  ;;  %v1916_v10 = vmov 0.0  }
 0x25c   :  { %v353_v12 = vpop.permute.xlu0 %352  ;;  %v299_v24 = vpop.permute.xlu1 %298  ;;  %807 = vmatprep.mubr.f32.mxu1 %v1916_v10 }
 0x25d   :  { %1885 = vset.pattern.permute.xlu0 %v1913_v63  ;;  %1880 = vset.pattern.permute.xlu1 %v1915_v2  ;;  %v333_v51 = vsel %vm332_vm13, %v331_v48, %v299_v24 }
 0x25e   :  { %1136 = vperm.xlu0 %1885, %v1968_v7   ;;  %672 = vperm.xlu1 %1880, %v2080_v57  }
 0x260   :  { %v356_v14 = vpop.permute.xlu0 %355  ;;  %v302_v29 = vpop.permute.xlu1 %301 }
 0x261   :  { %v335_v55 = vsel %vm2503_vm14, %v333_v51, %v302_v29 }
 0x262   :  { %1886 = vset.pattern.permute.xlu0 %v1912_v61  ;;  %1881 = vset.pattern.permute.xlu1 %v1914_v0  ;;  %v20_v0 = vld [vmem:[%s2497_s0 + $0x48] sm:$0xff] }
 0x263   :  { %652 = vperm.xlu1 %1881, %v2080_v57   ;;  %1253 = vperm.xlu0 %1886, %v33_v16  }
 0x264   :  { %v359_v15 = vpop.permute.xlu0 %358  ;;  %v305_v38 = vpop.permute.xlu1 %304 }
 0x267   :  { %656 = vperm.xlu1 %1881, %v2086_v58  }
 0x268   :  { %v362_v17 = vpop.permute.xlu0 %361  ;;  %v308_v52 = vpop.permute.xlu1 %307 }
 0x26b   :  { %1883 = vset.pattern.permute.xlu1 %v1911_v56  ;;  %v337_v56 = vsel %vm2502_vm15, %v335_v55, %v305_v38 }
 0x26c   :  { %v365_v19 = vpop.permute.xlu0 %364  ;;  %720 = vperm.xlu1 %1883, %v1968_v7   ;;  %v391_v7 = vsel %vm169_vm2, %v390_v27, %v353_v12  ;;  %v339_v57 = vsel %vm2501_vm3, %v337_v56, %v308_v52 }
 0x26d   :  { %v392_v31 = vsel %vm320_vm7, %v391_v7, %v356_v14 }
 0x270   :  { %v368_v20 = vpop.permute.xlu0 %367  ;;  %724 = vperm.xlu1 %1883, %v1961_v6  }
 0x274   :  { %v371_v22 = vpop.permute.xlu0 %370  ;;  %1884 = vset.pattern.permute.xlu1 %v1913_v63  ;;  %v19_v63 = vld [vmem:[%s2497_s0 + $0x40] sm:$0xff] }
 0x275   :  { %1132 = vperm.xlu1 %1884, %v1954_v5   ;;  %v393_v5 = vsel %vm322_vm8, %v392_v31, %v359_v15 }
 0x278   :  { %v374_v26 = vpop.permute.xlu0 %373 }
 0x279   :  { %1140 = vperm.xlu1 %1884, %v1961_v6   ;;  %v394_v6 = vsel %vm324_vm9, %v393_v5, %v362_v17  ;;  %v408_v1 = vpop.permute.xlu1 %407 }
 0x27a   :  { %v395_v36 = vsel %vm326_vm10, %v394_v6, %v365_v19 }
 0x27b   :  { %v396_v39 = vsel %vm328_vm11, %v395_v36, %v368_v20 }
 0x27c   :  { %v377_v28 = vpop.permute.xlu0 %376  ;;  %v397_v41 = vsel %vm330_vm12, %v396_v39, %v371_v22 }
 0x27d   :  { %1144 = vperm.xlu1 %1884, %v1977_v9   ;;  %v398_v9 = vsel %vm332_vm13, %v397_v41, %v374_v26 }
 0x27e   :  { %v399_v45 = vsel %vm2503_vm14, %v398_v9, %v377_v28  ;;  %v545_v2 = vpop.permute.xlu1 %544  ;;  %vm1292_vm14 = vcmask 1044480  }
 0x280   :  { %v380_v33 = vpop.permute.xlu0 %379 }
 0x281   :  { %v400_v47 = vsel %vm2502_vm15, %v399_v45, %v380_v33  ;;  %vm1290_vm15 = vcmask 1043456  }
 0x282   :  { %v549_v3 = vpop.permute.xlu1 %548 }
 0x284   :  { %v383_v42 = vpop.permute.xlu0 %382 }
 0x285   :  { %v401_v49 = vsel %vm2501_vm3, %v400_v47, %v383_v42 }
 0x287   :  { %v527_v4 = vpop.permute.xlu1 %526 }
 0x288   :  { %v386_v50 = vpop.permute.xlu0 %385 }
 0x289   :  { %v402_v54 = vsel %vm2500_vm1, %v401_v49, %v386_v50 }
 0x28a   :  { %v404_v58 = vmul.f32 %v403_v53, %v402_v54 }
 0x28c   :  { %v311_v59 = vpop.permute.xlu0 %310  ;;  %v416_v8 = vpop.permute.xlu1 %415 }
 0x28d   :  { %v341_v60 = vsel %vm2500_vm1, %v339_v57, %v311_v59 }
 0x28e   :  { %v405_v61 = vadd.f32 %v404_v58, %v341_v60 }
 0x290   :  { %1661 = vmatprep.subr.mxu0 %v405_v61 }
 0x291   :  { %1662 = vmatpush3.msra.mxu0 %v405_v61  ;;  %v585_v11 = vpop.permute.xlu1 %584 }
 0x292   :  { %1664 = vmatmul.mubr.msk.f32.vlgmr.msra.gmra.mrb[4].mxu0 %vm313_vm4, %v18_v62 }
 0x293   :  { %1666 = vmatprep.mubr.msk.f32.mxu0 %vm313_vm4, %v19_v63 }
 0x295   :  { %v589_v12 = vpop.permute.xlu1 %588 }
 0x296   :  { %1667 = vmatmul.mubr.msk.f32.gmra.mrb[6].mxu0 %vm313_vm4, %v20_v0 }
 0x297   :  { %896 = vmatprep.mubr.f32.mxu0 %v1916_v10 }
 0x29a   :  { %v2195_v13 = vpop.permute.xlu1 %568 }
 0x29d   :  { %v2210_v20 = vpop.permute.xlu0 %552 }
 0x29f   :  { %v2197_v14 = vpop.permute.xlu1 %556 }
 0x2a2   :  { %v522_v21 = vpop.permute.xlu0 %521 }
 0x2a4   :  { %v2199_v15 = vpop.permute.xlu1 %531 }
 0x2a6   :  { %v2214_v23 = vpop.permute.xlu0 %536 }
 0x2a9   :  { %v2204_v17 = vpop.permute.xlu1 %592 }
 0x2ab   :  { %v412_v25 = vpop.permute.xlu0 %411 }
 0x2ad   :  { %v2206_v18 = vpop.permute.xlu1 %596 }
 0x2af   :  { %v420_v27 = vpop.permute.xlu0 %419 }
 0x2b2   :  { %v2208_v19 = vpop.permute.xlu1 %576 }
 0x2b3   :  { %v565_v29 = vpop.permute.xlu0 %564 }
 0x2b7   :  { %v2212_v22 = vpop.permute.xlu1 %624  ;;  %v2222_v30 = vpop.permute.xlu0 %572 }
 0x2bc   :  { %v2216_v24 = vpop.permute.xlu1 %604  ;;  %v2226_v32 = vpop.permute.xlu0 %628 }
 0x2c0   :  { %v2218_v26 = vpop.permute.xlu1 %608 }
 0x2c1   :  { %v2230_v33 = vpop.permute.xlu0 %648 }
 0x2c5   :  { %v669_v28 = vpop.permute.xlu1 %668 }
 0x2c6   :  { %v2234_v6 = vpop.permute.xlu0 %612 }
 0x2ca   :  { %v2220_v7 = vpop.permute.xlu1 %644 }
 0x2cb   :  { %v665_v36 = vpop.permute.xlu0 %664 }
 0x2cf   :  { %v2224_v31 = vpop.permute.xlu1 %632  ;;  %v677_v43 = vpop.permute.xlu0 %676 }
 0x2d3   :  { %v2228_v5 = vpop.permute.xlu1 %636 }
 0x2d8   :  { %v2232_v34 = vpop.permute.xlu1 %616 }
 0x2dd   :  { %v673_v35 = vpop.permute.xlu1 %672 }
 0x2e2   :  { %v653_v37 = vpop.permute.xlu1 %652 }
 0x2e6   :  { %v657_v48 = vpop.permute.xlu1 %656 }
 0x365   :  { %v1665_v38 = vpop.f32.mrb[4].mxu0 }
 0x366   :  { %v2236_v39 = vadd.f32 %v1665_v38, %v412_v25  ;;  %v500_v40 = vpop.f32.mrb[5].mxu0 }
 0x367   :  { %v2238_v41 = vadd.f32 %v500_v40, %v408_v1 }
 0x368   :  { %v680_v42 = vadd.f32 %v669_v28, %v2236_v39  ;;  %v560_v9 = vadd.f32 %v549_v3, %v2236_v39  ;;  %v600_v44 = vadd.f32 %v589_v12, %v2236_v39  ;;  %v540_v45 = vadd.f32 %v527_v4, %v2236_v39 }
 0x369   :  { %v679_v46 = vadd.f32 %v665_v36, %v2238_v41  ;;  %v1668_v47 = vpop.f32.mrb[6].mxu0  ;;  %v559_v49 = vadd.f32 %v545_v2, %v2238_v41  ;;  %v599_v50 = vadd.f32 %v585_v11, %v2238_v41  ;;  %v539_v51 = vadd.f32 %v522_v21, %v2238_v41 }
 0x36a   :  { %v698_v52 = vmax.f32 %v680_v42, 0.0  ;;  %v2248_v53 = vadd.f32 %v1668_v47, %v420_v27  ;;  %v510_v54 = vpop.f32.mrb[7].mxu0  ;;  %v692_v55 = vmax.f32 %v560_v9, 0.0  ;;  %v694_v56 = vmax.f32 %v600_v44, 0.0 }
 0x36b   :  { %v690_v57 = vmax.f32 %v679_v46, 0.0  ;;  %v2250_v58 = vadd.f32 %v510_v54, %v416_v8  ;;  %v684_v59 = vmax.f32 %v559_v49, 0.0  ;;  %v686_v60 = vmax.f32 %v599_v50, 0.0 }
 0x36c   :  { %v682_v61 = vadd.f32 %v677_v43, %v2248_v53  ;;  %v662_v62 = vadd.f32 %v657_v48, %v2248_v53  ;;  %v683_v63 = vmax.f32 %v539_v51, 0.0  ;;  %v691_v0 = vmax.f32 %v540_v45, 0.0 }
 0x36d   :  { %v2254_v1 = vpack.c.bf16 %v698_v52, %v690_v57  ;;  %v681_v2 = vadd.f32 %v673_v35, %v2250_v58  ;;  %v661_v3 = vadd.f32 %v653_v37, %v2250_v58  ;;  %v1747_v4 = vpack.c.bf16 %v692_v55, %v684_v59 }
 0x36e   :  { %v714_v11 = vmax.f32 %v682_v61, 0.0  ;;  %v713_v12 = vmax.f32 %v662_v62, 0.0  ;;  %v1755_v16 = vpack.c.bf16 %v694_v56, %v686_v60  ;;  %v1749_v8 = vpack.c.bf16 %v691_v0, %v683_v63 }
 0x36f   :  { %v706_v21 = vmax.f32 %v681_v2, 0.0  ;;  %v705_v25 = vmax.f32 %v661_v3, 0.0  ;;  %1748 = vmatprep.subr.bf16.mxu1 %v1747_v4  ;;  %v579_v27 = vadd.f32 %v565_v29, %v2238_v41  ;;  %v580_v28 = vadd.f32 %v2195_v13, %v2236_v39 }
 0x370   :  { %1756 = vmatprep.subr.bf16.mxu0 %v1755_v16  ;;  %1750 = vmatpush1.bf16.msra.mxu1 %v1749_v8  ;;  %v561_v35 = vadd.f32 %v2210_v20, %v2250_v58  ;;  %v562_v36 = vadd.f32 %v2197_v14, %v2248_v53  ;;  %v601_v37 = vadd.f32 %v2204_v17, %v2250_v58  ;;  %v1917_v16 = vmov 0.0|0.0  }
 0x371   :  { %v1775_v38 = vpack.c.bf16 %v714_v11, %v706_v21  ;;  %v2267_v40 = vpack.c.bf16 %v713_v12, %v705_v25  ;;  %v685_v42 = vmax.f32 %v579_v27, 0.0  ;;  %v693_v43 = vmax.f32 %v580_v28, 0.0  ;;  %v2383_v25 = vpop.permute.xlu0 %716 }
 0x372   :  { %v700_v29 = vmax.f32 %v561_v35, 0.0  ;;  %v708_v9 = vmax.f32 %v562_v36, 0.0  ;;  %v602_v13 = vadd.f32 %v2206_v18, %v2248_v53  ;;  %v702_v44 = vmax.f32 %v601_v37, 0.0 }
 0x373   :  { %v1757_v45 = vpack.c.bf16 %v693_v43, %v685_v42  ;;  %v541_v20 = vadd.f32 %v2199_v15, %v2250_v58  ;;  %v542_v14 = vadd.f32 %v2214_v23, %v2248_v53  ;;  %v581_v17 = vadd.f32 %v2222_v30, %v2250_v58 }
 0x374   :  { %v1751_v46 = vpack.c.bf16 %v708_v9, %v700_v29  ;;  %v710_v47 = vmax.f32 %v602_v13, 0.0  ;;  %v582_v48 = vadd.f32 %v2208_v19, %v2248_v53  ;;  %v639_v49 = vadd.f32 %v2212_v22, %v2238_v41 }
 0x375   :  { %1758 = vmatpush1.bf16.msra.mxu0 %v1757_v45  ;;  %v699_v18 = vmax.f32 %v541_v20, 0.0  ;;  %v707_v50 = vmax.f32 %v542_v14, 0.0  ;;  %v701_v51 = vmax.f32 %v581_v17, 0.0  ;;  %v640_v15 = vadd.f32 %v2226_v32, %v2236_v39  ;;  %v2387_v35 = vpop.permute.xlu0 %728 }
 0x376   :  { %1752 = vmatprep.subr.bf16.mxu1 %v1751_v46  ;;  %v1759_v23 = vpack.c.bf16 %v710_v47, %v702_v44  ;;  %v709_v52 = vmax.f32 %v582_v48, 0.0  ;;  %v688_v54 = vmax.f32 %v639_v49, 0.0  ;;  %v619_v30 = vadd.f32 %v2216_v24, %v2238_v41  ;;  %v21_v24 = vld [vmem:[%s2497_s0 + $0x50] sm:$0xff] }
 0x377   :  { %v1753_v55 = vpack.c.bf16 %v707_v50, %v699_v18  ;;  %v696_v56 = vmax.f32 %v640_v15, 0.0  ;;  %v620_v19 = vadd.f32 %v2218_v26, %v2236_v39  ;;  %v659_v22 = vadd.f32 %v2220_v7, %v2238_v41 }
 0x378   :  { %1760 = vmatprep.subr.bf16.mxu0 %v1759_v23  ;;  %v1761_v57 = vpack.c.bf16 %v709_v52, %v701_v51  ;;  %v687_v59 = vmax.f32 %v619_v30, 0.0  ;;  %v660_v32 = vadd.f32 %v2230_v33, %v2236_v39  ;;  %v641_v60 = vadd.f32 %v2224_v31, %v2250_v58 }
 0x379   :  { %1754 = vmatpush1.bf16.msra.mxu1 %v1753_v55  ;;  %v1763_v61 = vpack.c.bf16 %v696_v56, %v688_v54  ;;  %v695_v62 = vmax.f32 %v620_v19, 0.0  ;;  %v689_v26 = vmax.f32 %v659_v22, 0.0  ;;  %v642_v7 = vadd.f32 %v2228_v5, %v2248_v53  ;;  %v2398_v50 = vpop.permute.xlu0 %1136 }
 0x37a   :  { %1762 = vmatpush1.bf16.msra.mxu0 %v1761_v57  ;;  %v697_v41 = vmax.f32 %v660_v32, 0.0  ;;  %v704_v63 = vmax.f32 %v641_v60, 0.0  ;;  %v621_v33 = vadd.f32 %v2234_v6, %v2250_v58  ;;  %v622_v31 = vadd.f32 %v2232_v34, %v2248_v53  ;;  %v22_v6 = vld [vmem:[%s2497_s0 + $0x58] sm:$0xff]  ;;  %v23_v53 = vld [vmem:[%s2497_s0 + $0x60] sm:$0xff]  ;;  %v24_v58 = vld [vmem:[%s2497_s0 + $0x68] sm:$0xff] }
 0x37b   :  { %1764 = vmatprep.subr.bf16.mxu1 %v1763_v61  ;;  %1772 = vmatprep.subr.bf16.mxu0 %v2254_v1  ;;  %v1765_v39 = vpack.c.bf16 %v695_v62, %v687_v59  ;;  %v712_v0 = vmax.f32 %v642_v7, 0.0  ;;  %v1298_v1 = vlaneseq  ;;  %v1918_v21 = vmov 1.0|1.0  }
 0x37c   :  { %1543 = vmatmul.mubr.msk.f32.vlgmr.msra.gmra.mrb[2].mxu1 %vm169_vm2, %v21_v24  ;;  %v1773_v2 = vpack.c.bf16 %v697_v41, %v689_v26  ;;  %v703_v3 = vmax.f32 %v621_v33, 0.0  ;;  %v711_v4 = vmax.f32 %v622_v31, 0.0 }
 0x37d   :  { %1547 = vmatmul.mubr.msk.f32.vlgmr.msra.gmra.mrb[8].mxu0 %vm169_vm2, %v21_v24  ;;  %1766 = vmatpush1.bf16.msra.mxu1 %v1765_v39  ;;  %v1767_v5 = vpack.c.bf16 %v712_v0, %v704_v63  ;;  %v1299_v11 = vshrl.u32 %v1298_v1, 7  ;;  %v1301_v12 = vand.u32 127, %v1298_v1 }
 0x37e   :  { %1774 = vmatpush1.bf16.msra.mxu0 %v1773_v2  ;;  %813 = vmatprep.mubr.f32.mxu1 %v1916_v10  ;;  %v1769_v34 = vpack.c.bf16 %v711_v4, %v703_v3 }
 0x37f   :  { %1768 = vmatprep.subr.bf16.mxu1 %v1767_v5  ;;  %1776 = vmatprep.subr.bf16.mxu0 %v1775_v38  ;;  %vm1302_vm1 = vcmp.eq.s32.totalorder %v1299_v11, %v1301_v12 }
 0x380   :  { %902 = vmatprep.mubr.f32.mxu0 %v1916_v10  ;;  %1544 = vmatmul.mubr.msk.f32.gmra.mrb[4].mxu1 %vm169_vm2, %v22_v6  ;;  %vm2343_vm3 = vmpackc.low %vm1302_vm1, %vm1302_vm1  ;;  %vm1919_vm1 = vmmov 0  }
 0x381   :  { %1548 = vmatmul.mubr.msk.f32.gmra.mrb[10].mxu0 %vm169_vm2, %v22_v6  ;;  %1770 = vmatpush1.bf16.msra.mxu1 %v1769_v34 }
 0x382   :  { %1778 = vmatpush1.bf16.msra.mxu0 %v2267_v40  ;;  %819 = vmatprep.mubr.f32.mxu1 %v1916_v10 }
 0x383   :  { %908 = vmatprep.mubr.f32.mxu0 %v1916_v10  ;;  %1779 = vmatprep.subr.bf16.mxu1 %v1917_v16 }
 0x384   :  { %1545 = vmatmul.mubr.msk.f32.gmra.mrb[6].mxu1 %vm169_vm2, %v23_v53  ;;  %1803 = vmatprep.subr.bf16.mxu0 %v1917_v16 }
 0x385   :  { %1549 = vmatmul.mubr.msk.f32.gmra.mrb[12].mxu0 %vm169_vm2, %v23_v53  ;;  %825 = vmatprep.mubr.f32.mxu1 %v1916_v10 }
 0x386   :  { %914 = vmatprep.mubr.f32.mxu0 %v1916_v10 }
 0x388   :  { %1546 = vmatmul.mubr.msk.f32.gmra.mrb[8].mxu1 %vm169_vm2, %v24_v58 }
 0x389   :  { %1550 = vmatmul.mubr.msk.f32.gmra.mrb[14].mxu0 %vm169_vm2, %v24_v58  ;;  %985 = vmatprep.mubr.f32.mxu1 %v1916_v10 }
 0x38a   :  { %1074 = vmatprep.mubr.f32.mxu0 %v1916_v10 }
 0x38c   :  { %1551 = vmatmul.mubr.msk.f32.vlgmr.msra.gmra.mrb[10].mxu1 %vm169_vm2, %v21_v24 }
 0x38d   :  { %1555 = vmatmul.mubr.msk.f32.vlgmr.msra.gmra.mrb[16].mxu0 %vm169_vm2, %v21_v24  ;;  %991 = vmatprep.mubr.f32.mxu1 %v1916_v10 }
 0x38e   :  { %1080 = vmatprep.mubr.f32.mxu0 %v1916_v10  ;;  %1781 = vmatpush3.bf16.msk.msra.mxu1 %vm2343_vm3, %v1918_v21 }
 0x38f   :  { %1805 = vmatpush3.bf16.msk.msra.mxu0 %vm2343_vm3, %v1918_v21  ;;  %1782 = vmatprep.subr.bf16.mxu1 %v1917_v16 }
 0x390   :  { %1552 = vmatmul.mubr.msk.f32.gmra.mrb[12].mxu1 %vm169_vm2, %v22_v6  ;;  %1806 = vmatprep.subr.bf16.mxu0 %v1917_v16 }
 0x391   :  { %1556 = vmatmul.mubr.msk.f32.gmra.mrb[18].mxu0 %vm169_vm2, %v22_v6  ;;  %997 = vmatprep.mubr.f32.mxu1 %v1916_v10 }
 0x392   :  { %1086 = vmatprep.mubr.f32.mxu0 %v1916_v10  ;;  %1784 = vmatpush3.bf16.msk.msra.mxu1 %vm2343_vm3, %v1918_v21 }
 0x393   :  { %1808 = vmatpush3.bf16.msk.msra.mxu0 %vm2343_vm3, %v1918_v21  ;;  %1785 = vmatprep.subr.bf16.mxu1 %v1917_v16 }
 0x394   :  { %1553 = vmatmul.mubr.msk.f32.gmra.mrb[14].mxu1 %vm169_vm2, %v23_v53  ;;  %1809 = vmatprep.subr.bf16.mxu0 %v1917_v16 }
 0x395   :  { %1557 = vmatmul.mubr.msk.f32.gmra.mrb[20].mxu0 %vm169_vm2, %v23_v53  ;;  %1003 = vmatprep.mubr.f32.mxu1 %v1916_v10 }
 0x396   :  { %1092 = vmatprep.mubr.f32.mxu0 %v1916_v10  ;;  %1787 = vmatpush3.bf16.msk.msra.mxu1 %vm2343_vm3, %v1918_v21 }
 0x397   :  { %1811 = vmatpush3.bf16.msk.msra.mxu0 %vm2343_vm3, %v1918_v21  ;;  %1788 = vmatprep.subr.bf16.mxu1 %v1917_v16 }
 0x398   :  { %1554 = vmatmul.mubr.msk.f32.gmra.mrb[16].mxu1 %vm169_vm2, %v24_v58  ;;  %1812 = vmatprep.subr.bf16.mxu0 %v1917_v16 }
 0x399   :  { %1558 = vmatmul.mubr.msk.f32.gmra.mrb[22].mxu0 %vm169_vm2, %v24_v58  ;;  %1701 = vmatprep.mubr.msk.f32.mxu1 %vm1919_vm1, %v1916_v10 }
 0x39a   :  { %1790 = vmatpush3.bf16.msk.msra.mxu1 %vm2343_vm3, %v1918_v21  ;;  %1736 = vmatprep.mubr.msk.f32.mxu0 %vm1919_vm1, %v1916_v10  ;;  %v2381_v10 = vpop.permute.xlu1 %720  ;;  %vm1287_vm1 = vcmask 1041408  }
 0x39b   :  { %1814 = vmatpush3.bf16.msk.msra.mxu0 %vm2343_vm3, %v1918_v21  ;;  %1791 = vmatprep.subr.bf16.mxu1 %v1917_v16 }
 0x39c   :  { %1815 = vmatprep.subr.bf16.mxu0 %v1917_v16 }
 0x39e   :  { %1793 = vmatpush3.bf16.msk.msra.mxu1 %vm2343_vm3, %v1918_v21  ;;  %v2385_v27 = vpop.permute.xlu1 %724 }
 0x39f   :  { %1817 = vmatpush3.bf16.msk.msra.mxu0 %vm2343_vm3, %v1918_v21  ;;  %1794 = vmatprep.subr.bf16.mxu1 %v1917_v16 }
 0x3a0   :  { %1818 = vmatprep.subr.bf16.mxu0 %v1917_v16 }
 0x3a2   :  { %1796 = vmatpush3.bf16.msk.msra.mxu1 %vm2343_vm3, %v1918_v21  ;;  %v2393_v20 = vpop.permute.xlu1 %1132 }
 0x3a3   :  { %1820 = vmatpush3.bf16.msk.msra.mxu0 %vm2343_vm3, %v1918_v21  ;;  %1797 = vmatprep.subr.bf16.mxu1 %v1917_v16 }
 0x3a4   :  { %1821 = vmatprep.subr.bf16.mxu0 %v1917_v16 }
 0x3a6   :  { %1799 = vmatpush3.bf16.msk.msra.mxu1 %vm2343_vm3, %v1918_v21  ;;  %v2404_v19 = vpop.permute.xlu1 %1140 }
 0x3a7   :  { %1823 = vmatpush3.bf16.msk.msra.mxu0 %vm2343_vm3, %v1918_v21  ;;  %1800 = vmatprep.subr.bf16.mxu1 %v1917_v16 }
 0x3a8   :  { %1824 = vmatprep.subr.bf16.mxu0 %v1917_v16 }
 0x3aa   :  { %1802 = vmatpush3.bf16.msk.msra.mxu1 %vm2343_vm3, %v1918_v21 }
 0x3ab   :  { %1826 = vmatpush3.bf16.msk.msra.mxu0 %vm2343_vm3, %v1918_v21  ;;  %vm1285_vm3 = vcmask 1040384  }
 0x44f   :  { %v809_v28 = vpop.f32.mrb[2].mxu1 }
 0x450   :  { %v810_v36 = vadd.f32 %v809_v28, %v2383_v25  ;;  %v811_v37 = vpop.f32.mrb[3].mxu1  ;;  %v898_v38 = vpop.f32.mrb[8].mxu0 }
 0x451   :  { %v812_v40 = vadd.f32 %v811_v37, %v2383_v25  ;;  %v899_v42 = vadd.f32 %v898_v38, %v2383_v25  ;;  %v900_v43 = vpop.f32.mrb[9].mxu0 }
 0x452   :  { %v1099_v29 = vmax.f32 %v810_v36, 0.0  ;;  %v901_v9 = vadd.f32 %v900_v43, %v2383_v25  ;;  %v2421_v36 = vpop.permute.xlu1 %1144 }
 0x453   :  { %v1100_v13 = vmax.f32 %v812_v40, 0.0  ;;  %v815_v44 = vpop.f32.mrb[4].mxu1  ;;  %v1101_v45 = vmax.f32 %v899_v42, 0.0 }
 0x454   :  { %v816_v14 = vadd.f32 %v815_v44, %v2381_v10  ;;  %v817_v17 = vpop.f32.mrb[5].mxu1  ;;  %v1102_v46 = vmax.f32 %v901_v9, 0.0  ;;  %v904_v47 = vpop.f32.mrb[10].mxu0  ;;  %v1147_v15 = vmul.f32 %v2393_v20, %v1099_v29 }
 0x455   :  { %v818_v48 = vadd.f32 %v817_v17, %v2381_v10  ;;  %v905_v49 = vadd.f32 %v904_v47, %v2381_v10  ;;  %v906_v18 = vpop.f32.mrb[11].mxu0  ;;  %v1148_v55 = vmul.f32 %v2393_v20, %v1100_v13  ;;  %v1149_v56 = vmul.f32 %v2393_v20, %v1101_v45 }
 0x456   :  { %v1107_v51 = vmax.f32 %v816_v14, 0.0  ;;  %v907_v23 = vadd.f32 %v906_v18, %v2381_v10  ;;  %v1150_v57 = vmul.f32 %v2393_v20, %v1102_v46 }
 0x457   :  { %v1108_v52 = vmax.f32 %v818_v48, 0.0  ;;  %v821_v54 = vpop.f32.mrb[6].mxu1  ;;  %v1109_v30 = vmax.f32 %v905_v49, 0.0 }
 0x458   :  { %v822_v22 = vadd.f32 %v821_v54, %v2385_v27  ;;  %v823_v59 = vpop.f32.mrb[7].mxu1  ;;  %v1110_v32 = vmax.f32 %v907_v23, 0.0  ;;  %v910_v60 = vpop.f32.mrb[12].mxu0  ;;  %v1155_v61 = vmul.f32 %v2398_v50, %v1107_v51 }
 0x459   :  { %v824_v24 = vadd.f32 %v823_v59, %v2385_v27  ;;  %v911_v62 = vadd.f32 %v910_v60, %v2385_v27  ;;  %v1156_v26 = vmul.f32 %v2398_v50, %v1108_v52  ;;  %v1157_v7 = vmul.f32 %v2398_v50, %v1109_v30  ;;  %v912_v41 = vpop.f32.mrb[13].mxu0 }
 0x45a   :  { %v1115_v63 = vmax.f32 %v822_v22, 0.0  ;;  %v1158_v33 = vmul.f32 %v2398_v50, %v1110_v32  ;;  %v1179_v31 = vadd.f32 %v1155_v61, %v1147_v15  ;;  %v913_v39 = vadd.f32 %v912_v41, %v2385_v27 }
 0x45b   :  { %v1116_v0 = vmax.f32 %v824_v24, 0.0  ;;  %v1117_v2 = vmax.f32 %v911_v62, 0.0  ;;  %v1188_v3 = vadd.f32 %v1156_v26, %v1148_v55  ;;  %v1197_v4 = vadd.f32 %v1157_v7, %v1149_v56  ;;  %v827_v5 = vpop.f32.mrb[8].mxu1 }
 0x45c   :  { %v1206_v6 = vadd.f32 %v1158_v33, %v1150_v57  ;;  %v1118_v34 = vmax.f32 %v913_v39, 0.0  ;;  %v828_v53 = vadd.f32 %v827_v5, %v2387_v35  ;;  %v916_v58 = vpop.f32.mrb[14].mxu0  ;;  %v1163_v1 = vmul.f32 %v2404_v19, %v1115_v63  ;;  %v829_v11 = vpop.f32.mrb[9].mxu1 }
 0x45d   :  { %v917_v12 = vadd.f32 %v916_v58, %v2387_v35  ;;  %v1164_v16 = vmul.f32 %v2404_v19, %v1116_v0  ;;  %v1165_v8 = vmul.f32 %v2404_v19, %v1117_v2  ;;  %v830_v21 = vadd.f32 %v829_v11, %v2387_v35  ;;  %v918_v28 = vpop.f32.mrb[15].mxu0 }
 0x45e   :  { %v1123_v37 = vmax.f32 %v828_v53, 0.0  ;;  %v1166_v38 = vmul.f32 %v2404_v19, %v1118_v34  ;;  %v1180_v40 = vadd.f32 %v1179_v31, %v1163_v1  ;;  %v919_v42 = vadd.f32 %v918_v28, %v2387_v35 }
 0x45f   :  { %v1125_v43 = vmax.f32 %v917_v12, 0.0  ;;  %v1189_v29 = vadd.f32 %v1188_v3, %v1164_v16  ;;  %v1198_v9 = vadd.f32 %v1197_v4, %v1165_v8  ;;  %v1124_v13 = vmax.f32 %v830_v21, 0.0  ;;  %v987_v44 = vpop.f32.mrb[10].mxu1 }
 0x460   :  { %v1207_v45 = vadd.f32 %v1206_v6, %v1166_v38  ;;  %v1126_v14 = vmax.f32 %v919_v42, 0.0  ;;  %v1171_v17 = vmul.f32 %v2421_v36, %v1123_v37  ;;  %v988_v46 = vadd.f32 %v987_v44, %v2383_v25  ;;  %v1076_v47 = vpop.f32.mrb[16].mxu0  ;;  %v989_v48 = vpop.f32.mrb[11].mxu1 }
 0x461   :  { %v1172_v49 = vmul.f32 %v2421_v36, %v1124_v13  ;;  %v1173_v18 = vmul.f32 %v2421_v36, %v1125_v43  ;;  %v1077_v51 = vadd.f32 %v1076_v47, %v2383_v25  ;;  %v990_v15 = vadd.f32 %v989_v48, %v2383_v25  ;;  %v1078_v23 = vpop.f32.mrb[17].mxu0 }
 0x462   :  { %v1174_v52 = vmul.f32 %v2421_v36, %v1126_v14  ;;  %v1181_v54 = vadd.f32 %v1180_v40, %v1171_v17  ;;  %v1103_v30 = vmax.f32 %v988_v46, 0.0  ;;  %v1079_v55 = vadd.f32 %v1078_v23, %v2383_v25 }
 0x463   :  { %v1190_v56 = vadd.f32 %v1189_v29, %v1172_v49  ;;  %v1199_v22 = vadd.f32 %v1198_v9, %v1173_v18  ;;  %v1105_v57 = vmax.f32 %v1077_v51, 0.0  ;;  %v1104_v59 = vmax.f32 %v990_v15, 0.0  ;;  %v993_v32 = vpop.f32.mrb[12].mxu1 }
 0x464   :  { %v1182_v60 = vrot.slane %v1181_v54, 4  ;;  %v1208_v61 = vadd.f32 %v1207_v45, %v1174_v52  ;;  %v1151_v24 = vmul.f32 %v2393_v20, %v1103_v30  ;;  %v1106_v62 = vmax.f32 %v1079_v55, 0.0  ;;  %v1082_v26 = vpop.f32.mrb[18].mxu0  ;;  %v995_v7 = vpop.f32.mrb[13].mxu1 }
 0x465   :  { %v1191_v41 = vrot.slane %v1190_v56, 4  ;;  %v1200_v63 = vrot.slane %v1199_v22, 4  ;;  %v1153_v33 = vmul.f32 %v2393_v20, %v1105_v57  ;;  %v1152_v31 = vmul.f32 %v2393_v20, %v1104_v59  ;;  %v1084_v39 = vpop.f32.mrb[19].mxu0 }
 0x466   :  { %v1183_v25 = vadd.f32 %v1182_v60, %v1181_v54  ;;  %v1209_v0 = vrot.slane %v1208_v61, 4  ;;  %v1154_v2 = vmul.f32 %v2393_v20, %v1106_v62  ;;  %v994_v3 = vadd.f32 %v993_v32, %v2381_v10 }
 0x467   :  { %v1192_v4 = vadd.f32 %v1191_v41, %v1190_v56  ;;  %v1201_v5 = vadd.f32 %v1200_v63, %v1199_v22  ;;  %v1083_v6 = vadd.f32 %v1082_v26, %v2381_v10  ;;  %v996_v34 = vadd.f32 %v995_v7, %v2381_v10  ;;  %v999_v53 = vpop.f32.mrb[14].mxu1 }
 0x468   :  { %v1210_v58 = vadd.f32 %v1209_v0, %v1208_v61  ;;  %v1111_v1 = vmax.f32 %v994_v3, 0.0  ;;  %v1085_v11 = vadd.f32 %v1084_v39, %v2381_v10  ;;  %v1000_v12 = vadd.f32 %v999_v53, %v2385_v27  ;;  %v1088_v16 = vpop.f32.mrb[20].mxu0  ;;  %v1001_v8 = vpop.f32.mrb[15].mxu1 }
 0x469   :  { %v1113_v21 = vmax.f32 %v1083_v6, 0.0  ;;  %v1112_v28 = vmax.f32 %v996_v34, 0.0  ;;  %v1089_v20 = vadd.f32 %v1088_v16, %v2385_v27  ;;  %v1002_v37 = vadd.f32 %v1001_v8, %v2385_v27  ;;  %v1090_v38 = vpop.f32.mrb[21].mxu0 }
 0x46a   :  { %v1159_v40 = vmul.f32 %v2398_v50, %v1111_v1  ;;  %v1114_v42 = vmax.f32 %v1085_v11, 0.0  ;;  %v1119_v43 = vmax.f32 %v1000_v12, 0.0  ;;  %v1091_v29 = vadd.f32 %v1090_v38, %v2385_v27 }
 0x46b   :  { %v1161_v9 = vmul.f32 %v2398_v50, %v1113_v21  ;;  %v1160_v10 = vmul.f32 %v2398_v50, %v1112_v28  ;;  %v1121_v13 = vmax.f32 %v1089_v20, 0.0  ;;  %v1120_v44 = vmax.f32 %v1002_v37, 0.0  ;;  %v1005_v45 = vpop.f32.mrb[16].mxu1  ;;  %v1254_v21 = vpop.permute.xlu0 %1253 }
 0x46c   :  { %v1215_v14 = vadd.f32 %v1159_v40, %v1151_v24  ;;  %v1162_v17 = vmul.f32 %v2398_v50, %v1114_v42  ;;  %v1167_v46 = vmul.f32 %v2404_v19, %v1119_v43  ;;  %v1122_v47 = vmax.f32 %v1091_v29, 0.0  ;;  %v1094_v48 = vpop.f32.mrb[22].mxu0  ;;  %v1007_v49 = vpop.f32.mrb[17].mxu1 }
 0x46d   :  { %v1233_v18 = vadd.f32 %v1161_v9, %v1153_v33  ;;  %v1224_v51 = vadd.f32 %v1160_v10, %v1152_v31  ;;  %v1169_v15 = vmul.f32 %v2404_v19, %v1121_v13  ;;  %v1168_v27 = vmul.f32 %v2404_v19, %v1120_v44  ;;  %v1096_v23 = vpop.f32.mrb[23].mxu0 }
 0x46e   :  { %v1242_v52 = vadd.f32 %v1162_v17, %v1154_v2  ;;  %v1216_v54 = vadd.f32 %v1215_v14, %v1167_v46  ;;  %v1170_v30 = vmul.f32 %v2404_v19, %v1122_v47  ;;  %v1006_v55 = vadd.f32 %v1005_v45, %v2387_v35 }
 0x46f   :  { %v1234_v56 = vadd.f32 %v1233_v18, %v1169_v15  ;;  %v1225_v50 = vadd.f32 %v1224_v51, %v1168_v27  ;;  %v1095_v22 = vadd.f32 %v1094_v48, %v2387_v35  ;;  %v1008_v57 = vadd.f32 %v1007_v49, %v2387_v35 }
 0x470   :  { %v1243_v59 = vadd.f32 %v1242_v52, %v1170_v30  ;;  %v1127_v32 = vmax.f32 %v1006_v55, 0.0  ;;  %v1097_v60 = vadd.f32 %v1096_v23, %v2387_v35  ;;  %v1184_v61 = vrot.slane %v1183_v25, 2 }
 0x471   :  { %v1129_v24 = vmax.f32 %v1095_v22, 0.0  ;;  %v1128_v62 = vmax.f32 %v1008_v57, 0.0  ;;  %v1193_v26 = vrot.slane %v1192_v4, 2  ;;  %v1202_v7 = vrot.slane %v1201_v5, 2 }
 0x472   :  { %v1175_v41 = vmul.f32 %v2421_v36, %v1127_v32  ;;  %v1130_v19 = vmax.f32 %v1097_v60, 0.0  ;;  %v1185_v63 = vadd.f32 %v1184_v61, %v1183_v25  ;;  %v1211_v33 = vrot.slane %v1210_v58, 2 }
 0x473   :  { %v1177_v31 = vmul.f32 %v2421_v36, %v1129_v24  ;;  %v1176_v39 = vmul.f32 %v2421_v36, %v1128_v62  ;;  %v1194_v0 = vadd.f32 %v1193_v26, %v1192_v4  ;;  %v1203_v2 = vadd.f32 %v1202_v7, %v1201_v5 }
 0x474   :  { %v1217_v3 = vadd.f32 %v1216_v54, %v1175_v41  ;;  %v1178_v6 = vmul.f32 %v2421_v36, %v1130_v19  ;;  %v1186_v35 = vrot.slane %v1185_v63, 1  ;;  %v1212_v34 = vadd.f32 %v1211_v33, %v1210_v58 }
 0x475   :  { %v1235_v53 = vadd.f32 %v1234_v56, %v1177_v31  ;;  %v1226_v1 = vadd.f32 %v1225_v50, %v1176_v39  ;;  %v1195_v11 = vrot.slane %v1194_v0, 1  ;;  %v1204_v12 = vrot.slane %v1203_v2, 1 }
 0x476   :  { %v1218_v16 = vrot.slane %v1217_v3, 4  ;;  %v1244_v8 = vadd.f32 %v1243_v59, %v1178_v6  ;;  %v1187_v25 = vadd.f32 %v1186_v35, %v1185_v63  ;;  %v1213_v28 = vrot.slane %v1212_v34, 1 }
 0x477   :  { %v1236_v20 = vrot.slane %v1235_v53, 4  ;;  %v1227_v37 = vrot.slane %v1226_v1, 4  ;;  %v1196_v38 = vadd.f32 %v1195_v11, %v1194_v0  ;;  %v1205_v40 = vadd.f32 %v1204_v12, %v1203_v2 }
 0x478   :  { %v1219_v4 = vadd.f32 %v1218_v16, %v1217_v3  ;;  %v1245_v5 = vrot.slane %v1244_v8, 4  ;;  %v1214_v42 = vadd.f32 %v1213_v28, %v1212_v34  ;;  %v1256_v14 = vadd.f32 %v1254_v21, %v1187_v25 }
 0x479   :  { %v1237_v36 = vadd.f32 %v1236_v20, %v1235_v53  ;;  %v1228_v43 = vadd.f32 %v1227_v37, %v1226_v1  ;;  %v1257_v58 = vadd.f32 %v1254_v21, %v1196_v38  ;;  %v1258_v29 = vadd.f32 %v1254_v21, %v1205_v40 }
 0x47a   :  { %v1220_v9 = vrot.slane %v1219_v4, 2  ;;  %v1246_v10 = vadd.f32 %v1245_v5, %v1244_v8  ;;  %v1259_v13 = vadd.f32 %v1254_v21, %v1214_v42 }
 0x47b   :  { %v1238_v44 = vrot.slane %v1237_v36, 2  ;;  %v1229_v45 = vrot.slane %v1228_v43, 2  ;;  %v1265_v17 = vrot.slane %v1257_v58, 7  ;;  %v1268_v48 = vrot.slane %v1258_v29, 6 }
 0x47c   :  { %v1221_v46 = vadd.f32 %v1220_v9, %v1219_v4  ;;  %v1247_v47 = vrot.slane %v1246_v10, 2  ;;  %v1271_v51 = vrot.slane %v1259_v13, 5 }
 0x47d   :  { %v1239_v49 = vadd.f32 %v1238_v44, %v1237_v36  ;;  %v1230_v18 = vadd.f32 %v1229_v45, %v1228_v43  ;;  %v1286_v15 = vsel %vm1285_vm3, %v1256_v14, %v1265_v17  ;;  %vm1294_vm3 = vcmask 1045504  }
 0x47e   :  { %v1222_v27 = vrot.slane %v1221_v46, 1  ;;  %v1248_v23 = vadd.f32 %v1247_v47, %v1246_v10  ;;  %v1288_v52 = vsel %vm1287_vm1, %v1286_v15, %v1268_v48  ;;  %vm1296_vm1 = vcmask 1046528  }
 0x47f   :  { %v1240_v54 = vrot.slane %v1239_v49, 1  ;;  %v1231_v30 = vrot.slane %v1230_v18, 1  ;;  %v1289_v55 = vsel %vm68_vm0, %v1288_v52, %v1271_v51  ;;  %vm2506_vm0 = vcmask 785408  }
 0x480   :  { %v1223_v56 = vadd.f32 %v1222_v27, %v1221_v46  ;;  %v1249_v50 = vrot.slane %v1248_v23, 1 }
 0x481   :  { %v1241_v22 = vadd.f32 %v1240_v54, %v1239_v49  ;;  %v1232_v57 = vadd.f32 %v1231_v30, %v1230_v18 }
 0x482   :  { %v1250_v59 = vadd.f32 %v1249_v50, %v1248_v23  ;;  %v1260_v32 = vadd.f32 %v1254_v21, %v1223_v56 }
 0x483   :  { %v1261_v60 = vadd.f32 %v1254_v21, %v1232_v57  ;;  %v1262_v61 = vadd.f32 %v1254_v21, %v1241_v22 }
 0x484   :  { %v1263_v24 = vadd.f32 %v1254_v21, %v1250_v59  ;;  %v1274_v62 = vrot.slane %v1260_v32, 4 }
 0x485   :  { %v1277_v26 = vrot.slane %v1261_v60, 3  ;;  %v1280_v7 = vrot.slane %v1262_v61, 2 }
 0x486   :  { %v1291_v41 = vsel %vm1290_vm15, %v1289_v55, %v1274_v62  ;;  %v1283_v19 = vrot.slane %v1263_v24, 1 }
 0x487   :  { %v1293_v63 = vsel %vm1292_vm14, %v1291_v41, %v1277_v26 }
 0x488   :  { %v1295_v33 = vsel %vm1294_vm3, %v1293_v63, %v1280_v7 }
 0x489   :  { %v1297_v31 = vsel %vm1296_vm1, %v1295_v33, %v1283_v19 }
 0x48a   :  { %1702 = vmatmul.mubr.f32.vlgmr.msra.gmra.mrb[18].mxu1 %v1297_v31 }
 0x55d   :  { %v1371_v39 = vpop.f32.mrb[18].mxu1 }
 0x55e   :  { %v1375_v0 = vmul.f32 0.0625, %v1371_v39  ;;  %v1703_v2 = vpop.f32.mrb[19].mxu1 }
 0x560   :  { %1383 = vrot.lane.b32.xlu0 %v1375_v0, %s1897_s5  ;;  %1377 = vrot.lane.b32.xlu1 %v1375_v0, %s1895_s3 }
 0x564   :  { %1389 = vrot.lane.b32.xlu0 %v1375_v0, %s1899_s7  ;;  %1380 = vrot.lane.b32.xlu1 %v1375_v0, %s1896_s4 }
 0x568   :  { %1395 = vrot.lane.b32.xlu0 %v1375_v0, %s1901_s9  ;;  %1386 = vrot.lane.b32.xlu1 %v1375_v0, %s1898_s6 }
 0x56c   :  { %1401 = vrot.lane.b32.xlu0 %v1375_v0, %s1903_s11  ;;  %1392 = vrot.lane.b32.xlu1 %v1375_v0, %s1900_s8 }
 0x570   :  { %1407 = vrot.lane.b32.xlu0 %v1375_v0, %s1905_s13  ;;  %1398 = vrot.lane.b32.xlu1 %v1375_v0, %s1902_s10 }
 0x574   :  { %1413 = vrot.lane.b32.xlu0 %v1375_v0, %s1907_s15  ;;  %1404 = vrot.lane.b32.xlu1 %v1375_v0, %s1904_s12 }
 0x578   :  { %1419 = vrot.lane.b32.xlu0 %v1375_v0, %s1910_s23  ;;  %1410 = vrot.lane.b32.xlu1 %v1375_v0, %s1906_s14 }
 0x57c   :  { %1416 = vrot.lane.b32.xlu1 %v1375_v0, %s1908_s16 }
 0x5d2   :  { %v1384_v3 = vpop.permute.xlu0 %1383  ;;  %v1378_v6 = vpop.permute.xlu1 %1377 }
 0x5d3   :  { %v1422_v35 = vsel %vm313_vm4, %v1375_v0, %v1378_v6 }
 0x5d6   :  { %v1390_v34 = vpop.permute.xlu0 %1389  ;;  %v1381_v53 = vpop.permute.xlu1 %1380 }
 0x5d7   :  { %v1423_v1 = vsel %vm315_vm5, %v1422_v35, %v1381_v53  ;;  %vm2508_vm5 = vcmask 916480  }
 0x5d8   :  { %v1424_v12 = vsel %vm317_vm6, %v1423_v1, %v1384_v3  ;;  %vm2509_vm6 = vcmask 982016  }
 0x5da   :  { %v1396_v11 = vpop.permute.xlu0 %1395  ;;  %v1387_v16 = vpop.permute.xlu1 %1386 }
 0x5db   :  { %v1425_v8 = vsel %vm169_vm2, %v1424_v12, %v1387_v16  ;;  %vm2507_vm2 = vcmask 850944  }
 0x5dc   :  { %v1426_v25 = vsel %vm320_vm7, %v1425_v8, %v1390_v34 }
 0x5de   :  { %v1402_v21 = vpop.permute.xlu0 %1401  ;;  %v1393_v28 = vpop.permute.xlu1 %1392 }
 0x5df   :  { %v1427_v20 = vsel %vm322_vm8, %v1426_v25, %v1393_v28 }
 0x5e0   :  { %v1428_v37 = vsel %vm324_vm9, %v1427_v20, %v1396_v11  ;;  %vm1526_vm9 = vcmask 57344  }
 0x5e2   :  { %v1399_v38 = vpop.permute.xlu1 %1398  ;;  %v1408_v40 = vpop.permute.xlu0 %1407 }
 0x5e3   :  { %v1429_v4 = vsel %vm326_vm10, %v1428_v37, %v1399_v38 }
 0x5e4   :  { %v1430_v5 = vsel %vm328_vm11, %v1429_v4, %v1402_v21 }
 0x5e6   :  { %v1405_v42 = vpop.permute.xlu1 %1404  ;;  %v1414_v43 = vpop.permute.xlu0 %1413 }
 0x5e7   :  { %v1431_v36 = vsel %vm330_vm12, %v1430_v5, %v1405_v42 }
 0x5e8   :  { %v1432_v58 = vsel %vm332_vm13, %v1431_v36, %v1408_v40 }
 0x5ea   :  { %v1411_v29 = vpop.permute.xlu1 %1410  ;;  %v1420_v44 = vpop.permute.xlu0 %1419 }
 0x5eb   :  { %v1433_v9 = vsel %vm2506_vm0, %v1432_v58, %v1411_v29 }
 0x5ec   :  { %v1434_v10 = vsel %vm2507_vm2, %v1433_v9, %v1414_v43 }
 0x5ee   :  { %v1417_v13 = vpop.permute.xlu1 %1416 }
 0x5ef   :  { %v1435_v45 = vsel %vm2508_vm5, %v1434_v10, %v1417_v13 }
 0x5f0   :  { %v1436_v14 = vsel %vm2509_vm6, %v1435_v45, %v1420_v44 }
 0x5f1   :  { %v1437_v17 = vsub.f32 %v1297_v31, %v1436_v14 }
 0x5f3   :  { %v1438_v46 = vmul.f32 %v1437_v17, %v1437_v17 }
 0x5f5   :  { %1737 = vmatmul.mubr.f32.vlgmr.msra.gmra.mrb[24].mxu0 %v1438_v46 }
 0x6c8   :  { %v1505_v47 = vpop.f32.mrb[24].mxu0 }
 0x6c9   :  { %v1509_v48 = vmul.f32 0.06666667, %v1505_v47  ;;  %v1738_v49 = vpop.f32.mrb[25].mxu0 }
 0x6cb   :  { %v1510_v18 = vmax.f32 %v1509_v48, 0.0 }
 0x6cd   :  { %1891 = vrsqrt.f32 %v1510_v18  ;;  %vm1513_vm7 = vcmp.eq.f32.partialorder %v1510_v18, inf  ;;  %v1516_v27 = vand.u32 2147483648, %v1510_v18  ;;  %vm1515_vm8 = vcmp.eq.f32.partialorder %v1510_v18, 0.0 }
 0x6d7   :  { %v1892_v51 = vpop.eup %1891 }
 0x6d8   :  { %v1512_v15 = vmul.f32 %v1892_v51, %v1510_v18 }
 0x6da   :  { %v1514_v23 = vsel %vm1513_vm7, %v1510_v18, %v1512_v15 }
 0x6db   :  { %v1517_v52 = vsel %vm1515_vm8, %v1516_v27, %v1514_v23 }
 0x6dc   :  { %v1518_v54 = vsel %vm313_vm4, %v1517_v52, 0.0 }
 0x6dd   :  { %v1519_v30 = vrot.slane %v1518_v54, 4 }
 0x6df   :  { %v1520_v55 = vadd.f32 %v1519_v30, %v1518_v54 }
 0x6e1   :  { %v1521_v56 = vrot.slane %v1520_v55, 2 }
 0x6e3   :  { %v1522_v50 = vadd.f32 %v1521_v56, %v1520_v55 }
 0x6e5   :  { %v1523_v22 = vrot.slane %v1522_v50, 1 }
 0x6e7   :  { %v1524_v57 = vadd.f32 %v1523_v22, %v1522_v50 }
 0x6e9   :  { %v1525_v59 = vmul.f32 0.125, %v1524_v57 }
 0x6eb   :  { %1527 = vst.msk [vmem:[%s2499_s2] sm:$0x1] %vm1526_vm9, %v1525_v59 }

</bundles_post_ra>
